<compile_context>
chip_gen: v7x
topology: tpu7x:2x2x1
jax: 0.10.0
libtpu: 0.0.40
codegen_flags: <defaults>
</compile_context>

<pallas_src>
import functools

import jax
import jax.numpy as jnp
from jax.experimental import pallas as pl
from jax.experimental.pallas import tpu as pltpu


NEG_INF = -1e30   # padded-class logit bias (not -inf: 0 * -inf = nan in the loss)
LANE = 128


def _round_up(x, m):
    return ((x + m - 1) // m) * m


# ----------------------------- Pallas kernel --------------------------------

def _mlp_kernel(ids_ref, tgt_ref, fused_ref, b1_ref, w2_ref, b2_ref,
                w3_ref, b3_ref, cw_ref, probs_ref, loss_ref):
    tb, seq_len = ids_ref.shape
    vocab_pad = fused_ref.shape[1]
    h0p = fused_ref.shape[2]

    # --- Embedding gather + Linear1 (+ folded BatchNorm1d eval), fused ------
    # h1 = sum_l one_hot(ids[:, l], vocab_pad) @ (table @ W1_l)
    ids = ids_ref[...]                                            # (tb, L) int32
    iota_v = jax.lax.broadcasted_iota(jnp.int32, (tb, vocab_pad), 1)
    h1 = jnp.zeros((tb, h0p), jnp.float32)
    for l in range(seq_len):                                      # static trip count
        onehot_l = jnp.where(iota_v == ids[:, l:l + 1], 1.0, 0.0)
        h1 = h1 + jnp.dot(onehot_l.astype(jnp.bfloat16), fused_ref[l],
                          preferred_element_type=jnp.float32)
    h1 = jnp.maximum(h1 + b1_ref[...], 0.0)
    # TODO(synk): nn.Dropout is stochastic at train time; identity (eval) here.

    # --- Linear 2 (+ folded BatchNorm1d eval) + ReLU ------------------------
    h2 = jnp.dot(h1.astype(jnp.bfloat16), w2_ref[...],
                 preferred_element_type=jnp.float32) + b2_ref[...]
    h2 = jnp.maximum(h2, 0.0)

    # --- Linear 3 (logits; padded class cols biased to -1e30) ---------------
    logits = jnp.dot(h2.astype(jnp.bfloat16), w3_ref[...],
                     preferred_element_type=jnp.float32) + b3_ref[...]

    # --- softmax (labels) ----------------------------------------------------
    m = jnp.max(logits, axis=-1, keepdims=True)
    e = jnp.exp(logits - m)                        # padded cols underflow to 0
    denom = jnp.sum(e, axis=-1, keepdims=True)
    probs = e * pl.reciprocal(denom, approx=False)
    probs_ref[...] = probs.astype(probs_ref.dtype)          # bf16, lane-dense store

    # --- weighted cross-entropy, reduced to per-tile scalars -----------------
    logp = (logits - m) - jnp.log(denom)                     # log_softmax
    cls_iota = jax.lax.broadcasted_iota(jnp.int32, logits.shape, 1)
    onehot = jnp.where(cls_iota == tgt_ref[...], 1.0, 0.0)   # padded rows (tgt=-1) -> 0
    w_y = jnp.sum(onehot * cw_ref[...], axis=-1, keepdims=True)      # (tb, 1)
    nll_w = -jnp.sum(onehot * logp, axis=-1, keepdims=True) * w_y    # (tb, 1)
    tile_nll = jnp.sum(nll_w)
    tile_wy = jnp.sum(w_y)

    # Tiny per-tile side block: [0, 0] = sum(w_y * nll), [0, 1] = sum(w_y).
    row = jax.lax.broadcasted_iota(jnp.int32, loss_ref.shape, 0)
    col = jax.lax.broadcasted_iota(jnp.int32, loss_ref.shape, 1)
    out = jnp.where((row == 0) & (col == 0), tile_nll, 0.0)
    out = jnp.where((row == 0) & (col == 1), tile_wy, out)
    loss_ref[...] = out


# ----------------------------- pallas_call wrapper ---------------------------

def mlp_forward_pallas(ids, tgt_idx, params, num_class):
    """ids: (B, L) int32 token ids, tgt_idx: (B, 1) int32 class indices.

    Returns (scalar loss, labels (B, num_class) f32)."""
    B, L = ids.shape
    fused = params["fused"]
    _, vocab_pad, h0p = fused.shape
    h1p = params["w2"].shape[1]
    cp = params["w3"].shape[1]

    # Batch tiling: 16-row multiples (bf16 sublane packing), up to 256 rows per
    # tile (v6e/v7x 256-wide MXU, bigger DMAs, fewer per-step overheads).  For
    # large B the tile is chosen so the grid has >= 2 steps, letting v7x's two
    # TensorCores both get work under dimension_semantics=("parallel",).
    if B <= 256:
        tile_b = _round_up(B, 16)
    else:
        tile_b = min(256, _round_up((B + 1) // 2, 16))
    b_pad = _round_up(B, tile_b)
    if b_pad != B:
        ids = jnp.pad(ids, ((0, b_pad - B), (0, 0)))                 # pad token id 0
        tgt_idx = jnp.pad(tgt_idx, ((0, b_pad - B), (0, 0)),
                          constant_values=-1)                        # no class -> 0 loss
    num_tiles = b_pad // tile_b

    cost = pl.CostEstimate(
        flops=2 * b_pad * (L * vocab_pad * h0p + h0p * h1p + h1p * cp),
        transcendentals=b_pad * (cp + 1),
        bytes_accessed=(
            ids.size * 4 + tgt_idx.size * 4
            + (fused.size + params["w2"].size + params["w3"].size) * 2
            + (params["b1"].size + params["b2"].size + params["b3"].size
               + params["cw"].size) * 4
            + b_pad * cp * 2                 # bf16 probs
            + num_tiles * 8 * cp * 4),       # per-tile loss pieces
    )

    probs_out, loss_out = pl.pallas_call(
        _mlp_kernel,
        out_shape=(
            jax.ShapeDtypeStruct((b_pad, cp), jnp.bfloat16),         # softmax probs
            jax.ShapeDtypeStruct((num_tiles * 8, cp), jnp.float32),  # loss pieces
        ),
        grid_spec=pltpu.PrefetchScalarGridSpec(
            num_scalar_prefetch=0,
            grid=(num_tiles,),
            in_specs=[
                pl.BlockSpec((tile_b, L), lambda i: (i, 0)),             # token ids
                pl.BlockSpec((tile_b, 1), lambda i: (i, 0)),             # target idx
                pl.BlockSpec((L, vocab_pad, h0p), lambda i: (0, 0, 0)),  # emb@W1 fused
                pl.BlockSpec((1, h0p), lambda i: (0, 0)),                # b1 (folded BN)
                pl.BlockSpec((h0p, h1p), lambda i: (0, 0)),              # w2 (folded BN)
                pl.BlockSpec((1, h1p), lambda i: (0, 0)),                # b2
                pl.BlockSpec((h1p, cp), lambda i: (0, 0)),               # w3
                pl.BlockSpec((1, cp), lambda i: (0, 0)),                 # b3 (pads -1e30)
                pl.BlockSpec((1, cp), lambda i: (0, 0)),                 # CE class weights
            ],
            out_specs=[
                pl.BlockSpec((tile_b, cp), lambda i: (i, 0)),            # probs (bf16)
                pl.BlockSpec((8, cp), lambda i: (i, 0)),                 # loss pieces
            ],
        ),
        compiler_params=pltpu.CompilerParams(
            dimension_semantics=("parallel",)),
        cost_estimate=cost,
    )(ids, tgt_idx, fused,
      params["b1"], params["w2"], params["b2"],
      params["w3"], params["b3"], params["cw"])

    labels = probs_out[:B, :num_class].astype(jnp.float32)
    loss = jnp.sum(loss_out[:, 0]) / jnp.sum(loss_out[:, 1])
    return loss, labels


# ----------------------------- JAX glue / module ----------------------------

class TextSentimentMLPPallas:
    def __init__(self, vocab_size, embed_dim=32, hidden_sizes=(64, 32),
                 max_length=16, num_class=8, init_std=0.05, seed=0):
        self.max_length = max_length
        self.embed_dim = embed_dim
        self.num_class = num_class

        key = jax.random.PRNGKey(seed)
        k_emb, k_w1, k_w2, k_w3 = jax.random.split(key, 4)
        in_dim = max_length * embed_dim
        h0, h1 = hidden_sizes

        # Padded (lane-dense) dims.
        vocab_pad = _round_up(vocab_size, LANE)
        h0p = _round_up(h0, LANE)
        h1p = _round_up(h1, LANE)
        cp = _round_up(num_class, LANE)

        eps = 1e-5
        # BatchNorm1d eval-mode params at init: gamma=1, beta=0, mean=0, var=1.
        s1 = jnp.ones((h0,), jnp.float32) / jnp.sqrt(jnp.ones((h0,)) + eps)
        t1 = jnp.zeros((h0,), jnp.float32)
        s2 = jnp.ones((h1,), jnp.float32) / jnp.sqrt(jnp.ones((h1,)) + eps)
        t2 = jnp.zeros((h1,), jnp.float32)

        embedding = init_std * jax.random.normal(k_emb, (vocab_size, embed_dim),
                                                 jnp.float32)
        w1 = init_std * jax.random.normal(k_w1, (in_dim, h0), jnp.float32)
        b1 = jnp.zeros((h0,), jnp.float32)
        w2 = init_std * jax.random.normal(k_w2, (h0, h1), jnp.float32)
        b2 = jnp.zeros((h1,), jnp.float32)
        w3 = init_std * jax.random.normal(k_w3, (h1, num_class), jnp.float32)
        b3 = jnp.zeros((num_class,), jnp.float32)

        # Fold BN(eval) into the preceding Linear: (xW + b)*s + t == x(W*s) + (b*s + t)
        w1f = jnp.zeros((in_dim, h0p), jnp.float32).at[:, :h0].set(w1 * s1[None, :])
        b1f = jnp.zeros((h0p,), jnp.float32).at[:h0].set(b1 * s1 + t1)
        w2f = jnp.zeros((h0p, h1p), jnp.float32).at[:h0, :h1].set(w2 * s2[None, :])
        b2f = jnp.zeros((h1p,), jnp.float32).at[:h1].set(b2 * s2 + t2)

        # Class padding: zero weight cols, -1e30 bias -> padded softmax mass ~0.
        w3p = jnp.zeros((h1p, cp), jnp.float32).at[:h1, :num_class].set(w3)
        b3p = jnp.full((cp,), NEG_INF, jnp.float32).at[:num_class].set(b3)

        # Fuse embedding table into Linear1 (eval mode):
        #   x_flat @ W1  ==  sum_l one_hot(ids[:, l]) @ (table @ W1_l)
        # fused[l] = table_pad @ W1[l*E:(l+1)*E, :]  -> (L, vocab_pad, h0p) bf16.
        table_pad = jnp.zeros((vocab_pad, embed_dim), jnp.float32)
        table_pad = table_pad.at[:vocab_size].set(embedding)
        w1r = w1f.reshape(max_length, embed_dim, h0p)
        fused = jnp.einsum("ve,leh->lvh", table_pad, w1r)            # f32 fold
        # TODO(synk): for very large vocabularies this fused-table approach is
        # impractical; a manual DMA gather of embedding rows would be needed.

        self.params = {
            "fused": fused.astype(jnp.bfloat16),
            "b1": b1f.reshape(1, h0p),
            "w2": w2f.astype(jnp.bfloat16), "b2": b2f.reshape(1, h1p),
            "w3": w3p.astype(jnp.bfloat16), "b3": b3p.reshape(1, cp),
        }
        # CrossEntropyLoss class weights (module hard-codes 8 classes); zero-padded.
        cw = jnp.array([1.0, 1.5, 1.5, 0.8, 1.0, 1.5, 1.5, 2.0], jnp.float32)
        self.params["cw"] = jnp.zeros((1, cp), jnp.float32).at[0, :num_class].set(
            cw[:num_class])

    @functools.partial(jax.jit, static_argnums=0)
    def forward(self, text, target):
        B, L = text.shape
        # pad / truncate to max_length (self.zeroarr semantics: pad with token 0)
        if L < self.max_length:
            text = jnp.concatenate(
                [text, jnp.zeros((B, self.max_length - L), text.dtype)], axis=1)
        else:
            text = text[:, :self.max_length]

        tgt_idx = jnp.argmax(target, axis=1).astype(jnp.int32).reshape(B, 1)
        loss, labels = mlp_forward_pallas(
            text.astype(jnp.int32), tgt_idx, self.params, self.num_class)
        return loss, labels


# ----------------------------- main ------------------------------------------

if __name__ == "__main__":
    VOCAB, EMBED, MAXLEN, NCLASS, BATCH, SEQ = 100, 32, 16, 8, 8, 12
    model = TextSentimentMLPPallas(vocab_size=VOCAB, embed_dim=EMBED,
                                   hidden_sizes=(64, 32), max_length=MAXLEN,
                                   num_class=NCLASS, init_std=0.05, seed=0)

    key = jax.random.PRNGKey(0)
    k_text, k_tgt = jax.random.split(key)
    text = jax.random.randint(k_text, (BATCH, SEQ), 0, VOCAB, dtype=jnp.int32)
    target = jax.random.uniform(k_tgt, (BATCH, NCLASS), dtype=jnp.float32)

    loss, labels = model.forward(text, target)
    jax.block_until_ready((loss, labels))

    # quick sanity: softmax rows sum to 1 (bf16 label precision), loss finite
    assert labels.shape == (BATCH, NCLASS)
    assert jnp.allclose(jnp.sum(labels, axis=1), 1.0, atol=2e-2)
    assert jnp.isfinite(loss)
    print("KERNEL_OK")
</pallas_src>

<mosaic_0001>
module attributes {stable_mosaic.version = 11 : i64} {
  func.func @_mlp_kernel(%arg0: i32, %arg1: memref<16x16xi32, #tpu.memory_space<vmem>>, %arg2: memref<16x1xi32, #tpu.memory_space<vmem>>, %arg3: memref<16x128x128xbf16, #tpu.memory_space<vmem>>, %arg4: memref<1x128xf32, #tpu.memory_space<vmem>>, %arg5: memref<128x128xbf16, #tpu.memory_space<vmem>>, %arg6: memref<1x128xf32, #tpu.memory_space<vmem>>, %arg7: memref<128x128xbf16, #tpu.memory_space<vmem>>, %arg8: memref<1x128xf32, #tpu.memory_space<vmem>>, %arg9: memref<1x128xf32, #tpu.memory_space<vmem>>, %arg10: memref<16x128xbf16, #tpu.memory_space<vmem>>, %arg11: memref<8x128xf32, #tpu.memory_space<vmem>>) attributes {dimension_semantics = [#tpu.dimension_semantics<parallel>], iteration_bounds = array<i64: 1>, scalar_prefetch = 0 : i64, scratch_operands = 0 : i64, tpu.core_type = #tpu.core_type<tc>, window_params = [{transform_indices = @transform_0, window_bounds = array<i64: 16, 16>}, {transform_indices = @transform_1, window_bounds = array<i64: 16, 1>}, {pipeline_mode = #tpu.pipeline_mode<synchronous>, transform_indices = @transform_2, window_bounds = array<i64: 16, 128, 128>}, {pipeline_mode = #tpu.pipeline_mode<synchronous>, transform_indices = @transform_3, window_bounds = array<i64: 1, 128>}, {pipeline_mode = #tpu.pipeline_mode<synchronous>, transform_indices = @transform_4, window_bounds = array<i64: 128, 128>}, {pipeline_mode = #tpu.pipeline_mode<synchronous>, transform_indices = @transform_5, window_bounds = array<i64: 1, 128>}, {pipeline_mode = #tpu.pipeline_mode<synchronous>, transform_indices = @transform_6, window_bounds = array<i64: 128, 128>}, {pipeline_mode = #tpu.pipeline_mode<synchronous>, transform_indices = @transform_7, window_bounds = array<i64: 1, 128>}, {pipeline_mode = #tpu.pipeline_mode<synchronous>, transform_indices = @transform_8, window_bounds = array<i64: 1, 128>}, {transform_indices = @transform_9, window_bounds = array<i64: 16, 128>}, {transform_indices = @transform_10, window_bounds = array<i64: 8, 128>}]} {
    %c0 = arith.constant 0 : index
    %c0_0 = arith.constant 0 : index
    %0 = vector.load %arg1[%c0, %c0_0] : memref<16x16xi32, #tpu.memory_space<vmem>>, vector<16x16xi32>
    %1 = tpu.iota {dimensions = array<i32: 1>} : vector<16x128xi32>
    %cst = arith.constant 0.000000e+00 : f32
    %2 = vector.broadcast %cst : f32 to vector<16x128xf32>
    %3 = vector.extract_strided_slice %0 {offsets = [0, 0], sizes = [16, 1], strides = [1, 1]} : vector<16x16xi32> to vector<16x1xi32>
    %4 = vector.broadcast %3 : vector<16x1xi32> to vector<16x128xi32>
    %5 = arith.cmpi eq, %1, %4 : vector<16x128xi32>
    %cst_1 = arith.constant 1.000000e+00 : f32
    %cst_2 = arith.constant 0.000000e+00 : f32
    %6 = vector.broadcast %cst_1 : f32 to vector<16x128xf32>
    %7 = vector.broadcast %cst_2 : f32 to vector<16x128xf32>
    %8 = arith.select %5, %6, %7 : vector<16x128xi1>, vector<16x128xf32>
    %9 = arith.truncf %8 : vector<16x128xf32> to vector<16x128xbf16>
    %c0_3 = arith.constant 0 : index
    %c0_4 = arith.constant 0 : index
    %c0_5 = arith.constant 0 : index
    %10 = vector.load %arg3[%c0_3, %c0_4, %c0_5] : memref<16x128x128xbf16, #tpu.memory_space<vmem>>, vector<1x128x128xbf16>
    %11 = vector.shape_cast %10 : vector<1x128x128xbf16> to vector<128x128xbf16>
    %cst_6 = arith.constant dense<0.000000e+00> : vector<16x128xf32>
    %12 = tpu.matmul %9, %11, %cst_6 {dimension_numbers = #tpu.dot_dimension_numbers<[1], [0], [0], [1], [0, 0, 1, 1], [], []>} : vector<16x128xbf16>, vector<128x128xbf16>, vector<16x128xf32> -> vector<16x128xf32>
    %13 = arith.addf %2, %12 : vector<16x128xf32>
    %14 = vector.extract_strided_slice %0 {offsets = [0, 1], sizes = [16, 1], strides = [1, 1]} : vector<16x16xi32> to vector<16x1xi32>
    %15 = vector.broadcast %14 : vector<16x1xi32> to vector<16x128xi32>
    %16 = arith.cmpi eq, %1, %15 : vector<16x128xi32>
    %cst_7 = arith.constant 1.000000e+00 : f32
    %cst_8 = arith.constant 0.000000e+00 : f32
    %17 = vector.broadcast %cst_7 : f32 to vector<16x128xf32>
    %18 = vector.broadcast %cst_8 : f32 to vector<16x128xf32>
    %19 = arith.select %16, %17, %18 : vector<16x128xi1>, vector<16x128xf32>
    %20 = arith.truncf %19 : vector<16x128xf32> to vector<16x128xbf16>
    %c1 = arith.constant 1 : index
    %c0_9 = arith.constant 0 : index
    %c0_10 = arith.constant 0 : index
    %21 = vector.load %arg3[%c1, %c0_9, %c0_10] : memref<16x128x128xbf16, #tpu.memory_space<vmem>>, vector<1x128x128xbf16>
    %22 = vector.shape_cast %21 : vector<1x128x128xbf16> to vector<128x128xbf16>
    %cst_11 = arith.constant dense<0.000000e+00> : vector<16x128xf32>
    %23 = tpu.matmul %20, %22, %cst_11 {dimension_numbers = #tpu.dot_dimension_numbers<[1], [0], [0], [1], [0, 0, 1, 1], [], []>} : vector<16x128xbf16>, vector<128x128xbf16>, vector<16x128xf32> -> vector<16x128xf32>
    %24 = arith.addf %13, %23 : vector<16x128xf32>
    %25 = vector.extract_strided_slice %0 {offsets = [0, 2], sizes = [16, 1], strides = [1, 1]} : vector<16x16xi32> to vector<16x1xi32>
    %26 = vector.broadcast %25 : vector<16x1xi32> to vector<16x128xi32>
    %27 = arith.cmpi eq, %1, %26 : vector<16x128xi32>
    %cst_12 = arith.constant 1.000000e+00 : f32
    %cst_13 = arith.constant 0.000000e+00 : f32
    %28 = vector.broadcast %cst_12 : f32 to vector<16x128xf32>
    %29 = vector.broadcast %cst_13 : f32 to vector<16x128xf32>
    %30 = arith.select %27, %28, %29 : vector<16x128xi1>, vector<16x128xf32>
    %31 = arith.truncf %30 : vector<16x128xf32> to vector<16x128xbf16>
    %c2 = arith.constant 2 : index
    %c0_14 = arith.constant 0 : index
    %c0_15 = arith.constant 0 : index
    %32 = vector.load %arg3[%c2, %c0_14, %c0_15] : memref<16x128x128xbf16, #tpu.memory_space<vmem>>, vector<1x128x128xbf16>
    %33 = vector.shape_cast %32 : vector<1x128x128xbf16> to vector<128x128xbf16>
    %cst_16 = arith.constant dense<0.000000e+00> : vector<16x128xf32>
    %34 = tpu.matmul %31, %33, %cst_16 {dimension_numbers = #tpu.dot_dimension_numbers<[1], [0], [0], [1], [0, 0, 1, 1], [], []>} : vector<16x128xbf16>, vector<128x128xbf16>, vector<16x128xf32> -> vector<16x128xf32>
    %35 = arith.addf %24, %34 : vector<16x128xf32>
    %36 = vector.extract_strided_slice %0 {offsets = [0, 3], sizes = [16, 1], strides = [1, 1]} : vector<16x16xi32> to vector<16x1xi32>
    %37 = vector.broadcast %36 : vector<16x1xi32> to vector<16x128xi32>
    %38 = arith.cmpi eq, %1, %37 : vector<16x128xi32>
    %cst_17 = arith.constant 1.000000e+00 : f32
    %cst_18 = arith.constant 0.000000e+00 : f32
    %39 = vector.broadcast %cst_17 : f32 to vector<16x128xf32>
    %40 = vector.broadcast %cst_18 : f32 to vector<16x128xf32>
    %41 = arith.select %38, %39, %40 : vector<16x128xi1>, vector<16x128xf32>
    %42 = arith.truncf %41 : vector<16x128xf32> to vector<16x128xbf16>
    %c3 = arith.constant 3 : index
    %c0_19 = arith.constant 0 : index
    %c0_20 = arith.constant 0 : index
    %43 = vector.load %arg3[%c3, %c0_19, %c0_20] : memref<16x128x128xbf16, #tpu.memory_space<vmem>>, vector<1x128x128xbf16>
    %44 = vector.shape_cast %43 : vector<1x128x128xbf16> to vector<128x128xbf16>
    %cst_21 = arith.constant dense<0.000000e+00> : vector<16x128xf32>
    %45 = tpu.matmul %42, %44, %cst_21 {dimension_numbers = #tpu.dot_dimension_numbers<[1], [0], [0], [1], [0, 0, 1, 1], [], []>} : vector<16x128xbf16>, vector<128x128xbf16>, vector<16x128xf32> -> vector<16x128xf32>
    %46 = arith.addf %35, %45 : vector<16x128xf32>
    %47 = vector.extract_strided_slice %0 {offsets = [0, 4], sizes = [16, 1], strides = [1, 1]} : vector<16x16xi32> to vector<16x1xi32>
    %48 = vector.broadcast %47 : vector<16x1xi32> to vector<16x128xi32>
    %49 = arith.cmpi eq, %1, %48 : vector<16x128xi32>
    %cst_22 = arith.constant 1.000000e+00 : f32
    %cst_23 = arith.constant 0.000000e+00 : f32
    %50 = vector.broadcast %cst_22 : f32 to vector<16x128xf32>
    %51 = vector.broadcast %cst_23 : f32 to vector<16x128xf32>
    %52 = arith.select %49, %50, %51 : vector<16x128xi1>, vector<16x128xf32>
    %53 = arith.truncf %52 : vector<16x128xf32> to vector<16x128xbf16>
    %c4 = arith.constant 4 : index
    %c0_24 = arith.constant 0 : index
    %c0_25 = arith.constant 0 : index
    %54 = vector.load %arg3[%c4, %c0_24, %c0_25] : memref<16x128x128xbf16, #tpu.memory_space<vmem>>, vector<1x128x128xbf16>
    %55 = vector.shape_cast %54 : vector<1x128x128xbf16> to vector<128x128xbf16>
    %cst_26 = arith.constant dense<0.000000e+00> : vector<16x128xf32>
    %56 = tpu.matmul %53, %55, %cst_26 {dimension_numbers = #tpu.dot_dimension_numbers<[1], [0], [0], [1], [0, 0, 1, 1], [], []>} : vector<16x128xbf16>, vector<128x128xbf16>, vector<16x128xf32> -> vector<16x128xf32>
    %57 = arith.addf %46, %56 : vector<16x128xf32>
    %58 = vector.extract_strided_slice %0 {offsets = [0, 5], sizes = [16, 1], strides = [1, 1]} : vector<16x16xi32> to vector<16x1xi32>
    %59 = vector.broadcast %58 : vector<16x1xi32> to vector<16x128xi32>
    %60 = arith.cmpi eq, %1, %59 : vector<16x128xi32>
    %cst_27 = arith.constant 1.000000e+00 : f32
    %cst_28 = arith.constant 0.000000e+00 : f32
    %61 = vector.broadcast %cst_27 : f32 to vector<16x128xf32>
    %62 = vector.broadcast %cst_28 : f32 to vector<16x128xf32>
    %63 = arith.select %60, %61, %62 : vector<16x128xi1>, vector<16x128xf32>
    %64 = arith.truncf %63 : vector<16x128xf32> to vector<16x128xbf16>
    %c5 = arith.constant 5 : index
    %c0_29 = arith.constant 0 : index
    %c0_30 = arith.constant 0 : index
    %65 = vector.load %arg3[%c5, %c0_29, %c0_30] : memref<16x128x128xbf16, #tpu.memory_space<vmem>>, vector<1x128x128xbf16>
    %66 = vector.shape_cast %65 : vector<1x128x128xbf16> to vector<128x128xbf16>
    %cst_31 = arith.constant dense<0.000000e+00> : vector<16x128xf32>
    %67 = tpu.matmul %64, %66, %cst_31 {dimension_numbers = #tpu.dot_dimension_numbers<[1], [0], [0], [1], [0, 0, 1, 1], [], []>} : vector<16x128xbf16>, vector<128x128xbf16>, vector<16x128xf32> -> vector<16x128xf32>
    %68 = arith.addf %57, %67 : vector<16x128xf32>
    %69 = vector.extract_strided_slice %0 {offsets = [0, 6], sizes = [16, 1], strides = [1, 1]} : vector<16x16xi32> to vector<16x1xi32>
    %70 = vector.broadcast %69 : vector<16x1xi32> to vector<16x128xi32>
    %71 = arith.cmpi eq, %1, %70 : vector<16x128xi32>
    %cst_32 = arith.constant 1.000000e+00 : f32
    %cst_33 = arith.constant 0.000000e+00 : f32
    %72 = vector.broadcast %cst_32 : f32 to vector<16x128xf32>
    %73 = vector.broadcast %cst_33 : f32 to vector<16x128xf32>
    %74 = arith.select %71, %72, %73 : vector<16x128xi1>, vector<16x128xf32>
    %75 = arith.truncf %74 : vector<16x128xf32> to vector<16x128xbf16>
    %c6 = arith.constant 6 : index
    %c0_34 = arith.constant 0 : index
    %c0_35 = arith.constant 0 : index
    %76 = vector.load %arg3[%c6, %c0_34, %c0_35] : memref<16x128x128xbf16, #tpu.memory_space<vmem>>, vector<1x128x128xbf16>
    %77 = vector.shape_cast %76 : vector<1x128x128xbf16> to vector<128x128xbf16>
    %cst_36 = arith.constant dense<0.000000e+00> : vector<16x128xf32>
    %78 = tpu.matmul %75, %77, %cst_36 {dimension_numbers = #tpu.dot_dimension_numbers<[1], [0], [0], [1], [0, 0, 1, 1], [], []>} : vector<16x128xbf16>, vector<128x128xbf16>, vector<16x128xf32> -> vector<16x128xf32>
    %79 = arith.addf %68, %78 : vector<16x128xf32>
    %80 = vector.extract_strided_slice %0 {offsets = [0, 7], sizes = [16, 1], strides = [1, 1]} : vector<16x16xi32> to vector<16x1xi32>
    %81 = vector.broadcast %80 : vector<16x1xi32> to vector<16x128xi32>
    %82 = arith.cmpi eq, %1, %81 : vector<16x128xi32>
    %cst_37 = arith.constant 1.000000e+00 : f32
    %cst_38 = arith.constant 0.000000e+00 : f32
    %83 = vector.broadcast %cst_37 : f32 to vector<16x128xf32>
    %84 = vector.broadcast %cst_38 : f32 to vector<16x128xf32>
    %85 = arith.select %82, %83, %84 : vector<16x128xi1>, vector<16x128xf32>
    %86 = arith.truncf %85 : vector<16x128xf32> to vector<16x128xbf16>
    %c7 = arith.constant 7 : index
    %c0_39 = arith.constant 0 : index
    %c0_40 = arith.constant 0 : index
    %87 = vector.load %arg3[%c7, %c0_39, %c0_40] : memref<16x128x128xbf16, #tpu.memory_space<vmem>>, vector<1x128x128xbf16>
    %88 = vector.shape_cast %87 : vector<1x128x128xbf16> to vector<128x128xbf16>
    %cst_41 = arith.constant dense<0.000000e+00> : vector<16x128xf32>
    %89 = tpu.matmul %86, %88, %cst_41 {dimension_numbers = #tpu.dot_dimension_numbers<[1], [0], [0], [1], [0, 0, 1, 1], [], []>} : vector<16x128xbf16>, vector<128x128xbf16>, vector<16x128xf32> -> vector<16x128xf32>
    %90 = arith.addf %79, %89 : vector<16x128xf32>
    %91 = vector.extract_strided_slice %0 {offsets = [0, 8], sizes = [16, 1], strides = [1, 1]} : vector<16x16xi32> to vector<16x1xi32>
    %92 = vector.broadcast %91 : vector<16x1xi32> to vector<16x128xi32>
    %93 = arith.cmpi eq, %1, %92 : vector<16x128xi32>
    %cst_42 = arith.constant 1.000000e+00 : f32
    %cst_43 = arith.constant 0.000000e+00 : f32
    %94 = vector.broadcast %cst_42 : f32 to vector<16x128xf32>
    %95 = vector.broadcast %cst_43 : f32 to vector<16x128xf32>
    %96 = arith.select %93, %94, %95 : vector<16x128xi1>, vector<16x128xf32>
    %97 = arith.truncf %96 : vector<16x128xf32> to vector<16x128xbf16>
    %c8 = arith.constant 8 : index
    %c0_44 = arith.constant 0 : index
    %c0_45 = arith.constant 0 : index
    %98 = vector.load %arg3[%c8, %c0_44, %c0_45] : memref<16x128x128xbf16, #tpu.memory_space<vmem>>, vector<1x128x128xbf16>
    %99 = vector.shape_cast %98 : vector<1x128x128xbf16> to vector<128x128xbf16>
    %cst_46 = arith.constant dense<0.000000e+00> : vector<16x128xf32>
    %100 = tpu.matmul %97, %99, %cst_46 {dimension_numbers = #tpu.dot_dimension_numbers<[1], [0], [0], [1], [0, 0, 1, 1], [], []>} : vector<16x128xbf16>, vector<128x128xbf16>, vector<16x128xf32> -> vector<16x128xf32>
    %101 = arith.addf %90, %100 : vector<16x128xf32>
    %102 = vector.extract_strided_slice %0 {offsets = [0, 9], sizes = [16, 1], strides = [1, 1]} : vector<16x16xi32> to vector<16x1xi32>
    %103 = vector.broadcast %102 : vector<16x1xi32> to vector<16x128xi32>
    %104 = arith.cmpi eq, %1, %103 : vector<16x128xi32>
    %cst_47 = arith.constant 1.000000e+00 : f32
    %cst_48 = arith.constant 0.000000e+00 : f32
    %105 = vector.broadcast %cst_47 : f32 to vector<16x128xf32>
    %106 = vector.broadcast %cst_48 : f32 to vector<16x128xf32>
    %107 = arith.select %104, %105, %106 : vector<16x128xi1>, vector<16x128xf32>
    %108 = arith.truncf %107 : vector<16x128xf32> to vector<16x128xbf16>
    %c9 = arith.constant 9 : index
    %c0_49 = arith.constant 0 : index
    %c0_50 = arith.constant 0 : index
    %109 = vector.load %arg3[%c9, %c0_49, %c0_50] : memref<16x128x128xbf16, #tpu.memory_space<vmem>>, vector<1x128x128xbf16>
    %110 = vector.shape_cast %109 : vector<1x128x128xbf16> to vector<128x128xbf16>
    %cst_51 = arith.constant dense<0.000000e+00> : vector<16x128xf32>
    %111 = tpu.matmul %108, %110, %cst_51 {dimension_numbers = #tpu.dot_dimension_numbers<[1], [0], [0], [1], [0, 0, 1, 1], [], []>} : vector<16x128xbf16>, vector<128x128xbf16>, vector<16x128xf32> -> vector<16x128xf32>
    %112 = arith.addf %101, %111 : vector<16x128xf32>
    %113 = vector.extract_strided_slice %0 {offsets = [0, 10], sizes = [16, 1], strides = [1, 1]} : vector<16x16xi32> to vector<16x1xi32>
    %114 = vector.broadcast %113 : vector<16x1xi32> to vector<16x128xi32>
    %115 = arith.cmpi eq, %1, %114 : vector<16x128xi32>
    %cst_52 = arith.constant 1.000000e+00 : f32
    %cst_53 = arith.constant 0.000000e+00 : f32
    %116 = vector.broadcast %cst_52 : f32 to vector<16x128xf32>
    %117 = vector.broadcast %cst_53 : f32 to vector<16x128xf32>
    %118 = arith.select %115, %116, %117 : vector<16x128xi1>, vector<16x128xf32>
    %119 = arith.truncf %118 : vector<16x128xf32> to vector<16x128xbf16>
    %c10 = arith.constant 10 : index
    %c0_54 = arith.constant 0 : index
    %c0_55 = arith.constant 0 : index
    %120 = vector.load %arg3[%c10, %c0_54, %c0_55] : memref<16x128x128xbf16, #tpu.memory_space<vmem>>, vector<1x128x128xbf16>
    %121 = vector.shape_cast %120 : vector<1x128x128xbf16> to vector<128x128xbf16>
    %cst_56 = arith.constant dense<0.000000e+00> : vector<16x128xf32>
    %122 = tpu.matmul %119, %121, %cst_56 {dimension_numbers = #tpu.dot_dimension_numbers<[1], [0], [0], [1], [0, 0, 1, 1], [], []>} : vector<16x128xbf16>, vector<128x128xbf16>, vector<16x128xf32> -> vector<16x128xf32>
    %123 = arith.addf %112, %122 : vector<16x128xf32>
    %124 = vector.extract_strided_slice %0 {offsets = [0, 11], sizes = [16, 1], strides = [1, 1]} : vector<16x16xi32> to vector<16x1xi32>
    %125 = vector.broadcast %124 : vector<16x1xi32> to vector<16x128xi32>
    %126 = arith.cmpi eq, %1, %125 : vector<16x128xi32>
    %cst_57 = arith.constant 1.000000e+00 : f32
    %cst_58 = arith.constant 0.000000e+00 : f32
    %127 = vector.broadcast %cst_57 : f32 to vector<16x128xf32>
    %128 = vector.broadcast %cst_58 : f32 to vector<16x128xf32>
    %129 = arith.select %126, %127, %128 : vector<16x128xi1>, vector<16x128xf32>
    %130 = arith.truncf %129 : vector<16x128xf32> to vector<16x128xbf16>
    %c11 = arith.constant 11 : index
    %c0_59 = arith.constant 0 : index
    %c0_60 = arith.constant 0 : index
    %131 = vector.load %arg3[%c11, %c0_59, %c0_60] : memref<16x128x128xbf16, #tpu.memory_space<vmem>>, vector<1x128x128xbf16>
    %132 = vector.shape_cast %131 : vector<1x128x128xbf16> to vector<128x128xbf16>
    %cst_61 = arith.constant dense<0.000000e+00> : vector<16x128xf32>
    %133 = tpu.matmul %130, %132, %cst_61 {dimension_numbers = #tpu.dot_dimension_numbers<[1], [0], [0], [1], [0, 0, 1, 1], [], []>} : vector<16x128xbf16>, vector<128x128xbf16>, vector<16x128xf32> -> vector<16x128xf32>
    %134 = arith.addf %123, %133 : vector<16x128xf32>
    %135 = vector.extract_strided_slice %0 {offsets = [0, 12], sizes = [16, 1], strides = [1, 1]} : vector<16x16xi32> to vector<16x1xi32>
    %136 = vector.broadcast %135 : vector<16x1xi32> to vector<16x128xi32>
    %137 = arith.cmpi eq, %1, %136 : vector<16x128xi32>
    %cst_62 = arith.constant 1.000000e+00 : f32
    %cst_63 = arith.constant 0.000000e+00 : f32
    %138 = vector.broadcast %cst_62 : f32 to vector<16x128xf32>
    %139 = vector.broadcast %cst_63 : f32 to vector<16x128xf32>
    %140 = arith.select %137, %138, %139 : vector<16x128xi1>, vector<16x128xf32>
    %141 = arith.truncf %140 : vector<16x128xf32> to vector<16x128xbf16>
    %c12 = arith.constant 12 : index
    %c0_64 = arith.constant 0 : index
    %c0_65 = arith.constant 0 : index
    %142 = vector.load %arg3[%c12, %c0_64, %c0_65] : memref<16x128x128xbf16, #tpu.memory_space<vmem>>, vector<1x128x128xbf16>
    %143 = vector.shape_cast %142 : vector<1x128x128xbf16> to vector<128x128xbf16>
    %cst_66 = arith.constant dense<0.000000e+00> : vector<16x128xf32>
    %144 = tpu.matmul %141, %143, %cst_66 {dimension_numbers = #tpu.dot_dimension_numbers<[1], [0], [0], [1], [0, 0, 1, 1], [], []>} : vector<16x128xbf16>, vector<128x128xbf16>, vector<16x128xf32> -> vector<16x128xf32>
    %145 = arith.addf %134, %144 : vector<16x128xf32>
    %146 = vector.extract_strided_slice %0 {offsets = [0, 13], sizes = [16, 1], strides = [1, 1]} : vector<16x16xi32> to vector<16x1xi32>
    %147 = vector.broadcast %146 : vector<16x1xi32> to vector<16x128xi32>
    %148 = arith.cmpi eq, %1, %147 : vector<16x128xi32>
    %cst_67 = arith.constant 1.000000e+00 : f32
    %cst_68 = arith.constant 0.000000e+00 : f32
    %149 = vector.broadcast %cst_67 : f32 to vector<16x128xf32>
    %150 = vector.broadcast %cst_68 : f32 to vector<16x128xf32>
    %151 = arith.select %148, %149, %150 : vector<16x128xi1>, vector<16x128xf32>
    %152 = arith.truncf %151 : vector<16x128xf32> to vector<16x128xbf16>
    %c13 = arith.constant 13 : index
    %c0_69 = arith.constant 0 : index
    %c0_70 = arith.constant 0 : index
    %153 = vector.load %arg3[%c13, %c0_69, %c0_70] : memref<16x128x128xbf16, #tpu.memory_space<vmem>>, vector<1x128x128xbf16>
    %154 = vector.shape_cast %153 : vector<1x128x128xbf16> to vector<128x128xbf16>
    %cst_71 = arith.constant dense<0.000000e+00> : vector<16x128xf32>
    %155 = tpu.matmul %152, %154, %cst_71 {dimension_numbers = #tpu.dot_dimension_numbers<[1], [0], [0], [1], [0, 0, 1, 1], [], []>} : vector<16x128xbf16>, vector<128x128xbf16>, vector<16x128xf32> -> vector<16x128xf32>
    %156 = arith.addf %145, %155 : vector<16x128xf32>
    %157 = vector.extract_strided_slice %0 {offsets = [0, 14], sizes = [16, 1], strides = [1, 1]} : vector<16x16xi32> to vector<16x1xi32>
    %158 = vector.broadcast %157 : vector<16x1xi32> to vector<16x128xi32>
    %159 = arith.cmpi eq, %1, %158 : vector<16x128xi32>
    %cst_72 = arith.constant 1.000000e+00 : f32
    %cst_73 = arith.constant 0.000000e+00 : f32
    %160 = vector.broadcast %cst_72 : f32 to vector<16x128xf32>
    %161 = vector.broadcast %cst_73 : f32 to vector<16x128xf32>
    %162 = arith.select %159, %160, %161 : vector<16x128xi1>, vector<16x128xf32>
    %163 = arith.truncf %162 : vector<16x128xf32> to vector<16x128xbf16>
    %c14 = arith.constant 14 : index
    %c0_74 = arith.constant 0 : index
    %c0_75 = arith.constant 0 : index
    %164 = vector.load %arg3[%c14, %c0_74, %c0_75] : memref<16x128x128xbf16, #tpu.memory_space<vmem>>, vector<1x128x128xbf16>
    %165 = vector.shape_cast %164 : vector<1x128x128xbf16> to vector<128x128xbf16>
    %cst_76 = arith.constant dense<0.000000e+00> : vector<16x128xf32>
    %166 = tpu.matmul %163, %165, %cst_76 {dimension_numbers = #tpu.dot_dimension_numbers<[1], [0], [0], [1], [0, 0, 1, 1], [], []>} : vector<16x128xbf16>, vector<128x128xbf16>, vector<16x128xf32> -> vector<16x128xf32>
    %167 = arith.addf %156, %166 : vector<16x128xf32>
    %168 = vector.extract_strided_slice %0 {offsets = [0, 15], sizes = [16, 1], strides = [1, 1]} : vector<16x16xi32> to vector<16x1xi32>
    %169 = vector.broadcast %168 : vector<16x1xi32> to vector<16x128xi32>
    %170 = arith.cmpi eq, %1, %169 : vector<16x128xi32>
    %cst_77 = arith.constant 1.000000e+00 : f32
    %cst_78 = arith.constant 0.000000e+00 : f32
    %171 = vector.broadcast %cst_77 : f32 to vector<16x128xf32>
    %172 = vector.broadcast %cst_78 : f32 to vector<16x128xf32>
    %173 = arith.select %170, %171, %172 : vector<16x128xi1>, vector<16x128xf32>
    %174 = arith.truncf %173 : vector<16x128xf32> to vector<16x128xbf16>
    %c15 = arith.constant 15 : index
    %c0_79 = arith.constant 0 : index
    %c0_80 = arith.constant 0 : index
    %175 = vector.load %arg3[%c15, %c0_79, %c0_80] : memref<16x128x128xbf16, #tpu.memory_space<vmem>>, vector<1x128x128xbf16>
    %176 = vector.shape_cast %175 : vector<1x128x128xbf16> to vector<128x128xbf16>
    %cst_81 = arith.constant dense<0.000000e+00> : vector<16x128xf32>
    %177 = tpu.matmul %174, %176, %cst_81 {dimension_numbers = #tpu.dot_dimension_numbers<[1], [0], [0], [1], [0, 0, 1, 1], [], []>} : vector<16x128xbf16>, vector<128x128xbf16>, vector<16x128xf32> -> vector<16x128xf32>
    %178 = arith.addf %167, %177 : vector<16x128xf32>
    %c0_82 = arith.constant 0 : index
    %c0_83 = arith.constant 0 : index
    %179 = vector.load %arg4[%c0_82, %c0_83] : memref<1x128xf32, #tpu.memory_space<vmem>>, vector<1x128xf32>
    %180 = vector.broadcast %179 : vector<1x128xf32> to vector<16x128xf32>
    %181 = arith.addf %178, %180 : vector<16x128xf32>
    %cst_84 = arith.constant 0.000000e+00 : f32
    %182 = vector.broadcast %cst_84 : f32 to vector<16x128xf32>
    %183 = arith.maximumf %181, %182 : vector<16x128xf32>
    %184 = arith.truncf %183 : vector<16x128xf32> to vector<16x128xbf16>
    %c0_85 = arith.constant 0 : index
    %c0_86 = arith.constant 0 : index
    %185 = vector.load %arg5[%c0_85, %c0_86] : memref<128x128xbf16, #tpu.memory_space<vmem>>, vector<128x128xbf16>
    %cst_87 = arith.constant dense<0.000000e+00> : vector<16x128xf32>
    %186 = tpu.matmul %184, %185, %cst_87 {dimension_numbers = #tpu.dot_dimension_numbers<[1], [0], [0], [1], [0, 0, 1, 1], [], []>} : vector<16x128xbf16>, vector<128x128xbf16>, vector<16x128xf32> -> vector<16x128xf32>
    %c0_88 = arith.constant 0 : index
    %c0_89 = arith.constant 0 : index
    %187 = vector.load %arg6[%c0_88, %c0_89] : memref<1x128xf32, #tpu.memory_space<vmem>>, vector<1x128xf32>
    %188 = vector.broadcast %187 : vector<1x128xf32> to vector<16x128xf32>
    %189 = arith.addf %186, %188 : vector<16x128xf32>
    %cst_90 = arith.constant 0.000000e+00 : f32
    %190 = vector.broadcast %cst_90 : f32 to vector<16x128xf32>
    %191 = arith.maximumf %189, %190 : vector<16x128xf32>
    %192 = arith.truncf %191 : vector<16x128xf32> to vector<16x128xbf16>
    %c0_91 = arith.constant 0 : index
    %c0_92 = arith.constant 0 : index
    %193 = vector.load %arg7[%c0_91, %c0_92] : memref<128x128xbf16, #tpu.memory_space<vmem>>, vector<128x128xbf16>
    %cst_93 = arith.constant dense<0.000000e+00> : vector<16x128xf32>
    %194 = tpu.matmul %192, %193, %cst_93 {dimension_numbers = #tpu.dot_dimension_numbers<[1], [0], [0], [1], [0, 0, 1, 1], [], []>} : vector<16x128xbf16>, vector<128x128xbf16>, vector<16x128xf32> -> vector<16x128xf32>
    %c0_94 = arith.constant 0 : index
    %c0_95 = arith.constant 0 : index
    %195 = vector.load %arg8[%c0_94, %c0_95] : memref<1x128xf32, #tpu.memory_space<vmem>>, vector<1x128xf32>
    %196 = vector.broadcast %195 : vector<1x128xf32> to vector<16x128xf32>
    %197 = arith.addf %194, %196 : vector<16x128xf32>
    %cst_96 = arith.constant dense<0xFF800000> : vector<16xf32>
    %198 = vector.multi_reduction <maximumf>, %197, %cst_96 [1] : vector<16x128xf32> to vector<16xf32>
    %199 = vector.shape_cast %198 : vector<16xf32> to vector<16x1xf32>
    %200 = vector.broadcast %199 : vector<16x1xf32> to vector<16x128xf32>
    %201 = arith.subf %197, %200 : vector<16x128xf32>
    %202 = math.exp %201 : vector<16x128xf32>
    %cst_97 = arith.constant dense<0.000000e+00> : vector<16xf32>
    %203 = vector.multi_reduction <add>, %202, %cst_97 [1] : vector<16x128xf32> to vector<16xf32>
    %204 = vector.shape_cast %203 : vector<16xf32> to vector<16x1xf32>
    %205 = tpu.reciprocal %204 : vector<16x1xf32> -> vector<16x1xf32>
    %206 = vector.broadcast %205 : vector<16x1xf32> to vector<16x128xf32>
    %207 = arith.mulf %202, %206 : vector<16x128xf32>
    %208 = arith.truncf %207 : vector<16x128xf32> to vector<16x128xbf16>
    %c0_98 = arith.constant 0 : index
    %c0_99 = arith.constant 0 : index
    %209 = vector.load %arg10[%c0_98, %c0_99] : memref<16x128xbf16, #tpu.memory_space<vmem>>, vector<16x128xbf16>
    tpu.vector_store %arg10[%c0_98, %c0_99], %208 {strides = array<i32>} : memref<16x128xbf16, #tpu.memory_space<vmem>>, vector<16x128xbf16>,
    %210 = vector.broadcast %199 : vector<16x1xf32> to vector<16x128xf32>
    %211 = arith.subf %197, %210 : vector<16x128xf32>
    %212 = math.log %204 : vector<16x1xf32>
    %213 = vector.broadcast %212 : vector<16x1xf32> to vector<16x128xf32>
    %214 = arith.subf %211, %213 : vector<16x128xf32>
    %215 = tpu.iota {dimensions = array<i32: 1>} : vector<16x128xi32>
    %c0_100 = arith.constant 0 : index
    %c0_101 = arith.constant 0 : index
    %216 = vector.load %arg2[%c0_100, %c0_101] : memref<16x1xi32, #tpu.memory_space<vmem>>, vector<16x1xi32>
    %217 = vector.broadcast %216 : vector<16x1xi32> to vector<16x128xi32>
    %218 = arith.cmpi eq, %215, %217 : vector<16x128xi32>
    %cst_102 = arith.constant 1.000000e+00 : f32
    %cst_103 = arith.constant 0.000000e+00 : f32
    %219 = vector.broadcast %cst_102 : f32 to vector<16x128xf32>
    %220 = vector.broadcast %cst_103 : f32 to vector<16x128xf32>
    %221 = arith.select %218, %219, %220 : vector<16x128xi1>, vector<16x128xf32>
    %c0_104 = arith.constant 0 : index
    %c0_105 = arith.constant 0 : index
    %222 = vector.load %arg9[%c0_104, %c0_105] : memref<1x128xf32, #tpu.memory_space<vmem>>, vector<1x128xf32>
    %223 = vector.broadcast %222 : vector<1x128xf32> to vector<16x128xf32>
    %224 = arith.mulf %221, %223 : vector<16x128xf32>
    %cst_106 = arith.constant dense<0.000000e+00> : vector<16xf32>
    %225 = vector.multi_reduction <add>, %224, %cst_106 [1] : vector<16x128xf32> to vector<16xf32>
    %226 = vector.shape_cast %225 : vector<16xf32> to vector<16x1xf32>
    %227 = arith.mulf %221, %214 : vector<16x128xf32>
    %cst_107 = arith.constant dense<0.000000e+00> : vector<16xf32>
    %228 = vector.multi_reduction <add>, %227, %cst_107 [1] : vector<16x128xf32> to vector<16xf32>
    %229 = vector.shape_cast %228 : vector<16xf32> to vector<16x1xf32>
    %cst_108 = arith.constant 0.000000e+00 : f32
    %230 = vector.broadcast %cst_108 : f32 to vector<16x1xf32>
    %231 = arith.subf %230, %229 : vector<16x1xf32>
    %232 = arith.mulf %231, %226 : vector<16x1xf32>
    %233 = vector.shape_cast %232 : vector<16x1xf32> to vector<1x16x1xf32>
    %cst_109 = arith.constant dense<0.000000e+00> : vector<1xf32>
    %234 = vector.multi_reduction <add>, %233, %cst_109 [1, 2] : vector<1x16x1xf32> to vector<1xf32>
    %235 = vector.shape_cast %234 : vector<1xf32> to vector<1x1x1xf32>
    %236 = vector.extract %235[0, 0, 0] : f32 from vector<1x1x1xf32>
    %237 = vector.shape_cast %226 : vector<16x1xf32> to vector<1x16x1xf32>
    %cst_110 = arith.constant dense<0.000000e+00> : vector<1xf32>
    %238 = vector.multi_reduction <add>, %237, %cst_110 [1, 2] : vector<1x16x1xf32> to vector<1xf32>
    %239 = vector.shape_cast %238 : vector<1xf32> to vector<1x1x1xf32>
    %240 = vector.extract %239[0, 0, 0] : f32 from vector<1x1x1xf32>
    %241 = tpu.iota {dimensions = array<i32: 0>} : vector<8x128xi32>
    %242 = tpu.iota {dimensions = array<i32: 1>} : vector<8x128xi32>
    %c0_i32 = arith.constant 0 : i32
    %243 = vector.broadcast %c0_i32 : i32 to vector<8x128xi32>
    %244 = arith.cmpi eq, %241, %243 : vector<8x128xi32>
    %c0_i32_111 = arith.constant 0 : i32
    %245 = vector.broadcast %c0_i32_111 : i32 to vector<8x128xi32>
    %246 = arith.cmpi eq, %242, %245 : vector<8x128xi32>
    %247 = arith.andi %244, %246 : vector<8x128xi1>
    %cst_112 = arith.constant 0.000000e+00 : f32
    %248 = vector.broadcast %236 : f32 to vector<8x128xf32>
    %249 = vector.broadcast %cst_112 : f32 to vector<8x128xf32>
    %250 = arith.select %247, %248, %249 : vector<8x128xi1>, vector<8x128xf32>
    %c0_i32_113 = arith.constant 0 : i32
    %251 = vector.broadcast %c0_i32_113 : i32 to vector<8x128xi32>
    %252 = arith.cmpi eq, %241, %251 : vector<8x128xi32>
    %c1_i32 = arith.constant 1 : i32
    %253 = vector.broadcast %c1_i32 : i32 to vector<8x128xi32>
    %254 = arith.cmpi eq, %242, %253 : vector<8x128xi32>
    %255 = arith.andi %252, %254 : vector<8x128xi1>
    %256 = vector.broadcast %240 : f32 to vector<8x128xf32>
    %257 = arith.select %255, %256, %250 : vector<8x128xi1>, vector<8x128xf32>
    %c0_114 = arith.constant 0 : index
    %c0_115 = arith.constant 0 : index
    %258 = vector.load %arg11[%c0_114, %c0_115] : memref<8x128xf32, #tpu.memory_space<vmem>>, vector<8x128xf32>
    tpu.vector_store %arg11[%c0_114, %c0_115], %257 {strides = array<i32>} : memref<8x128xf32, #tpu.memory_space<vmem>>, vector<8x128xf32>,
    return
  }
  func.func @transform_0(%arg0: i32) -> (i32, i32) {
    %c0_i32 = arith.constant 0 : i32
    %c0_i32_0 = arith.constant 0 : i32
    return %arg0, %c0_i32 : i32, i32
  }
  func.func @transform_1(%arg0: i32) -> (i32, i32) {
    %c0_i32 = arith.constant 0 : i32
    %c0_i32_0 = arith.constant 0 : i32
    return %arg0, %c0_i32 : i32, i32
  }
  func.func @transform_2(%arg0: i32) -> (i32, i32, i32) {
    %c0_i32 = arith.constant 0 : i32
    %c0_i32_0 = arith.constant 0 : i32
    %c0_i32_1 = arith.constant 0 : i32
    %c0_i32_2 = arith.constant 0 : i32
    return %c0_i32, %c0_i32_0, %c0_i32_1 : i32, i32, i32
  }
  func.func @transform_3(%arg0: i32) -> (i32, i32) {
    %c0_i32 = arith.constant 0 : i32
    %c0_i32_0 = arith.constant 0 : i32
    %c0_i32_1 = arith.constant 0 : i32
    return %c0_i32, %c0_i32_0 : i32, i32
  }
  func.func @transform_4(%arg0: i32) -> (i32, i32) {
    %c0_i32 = arith.constant 0 : i32
    %c0_i32_0 = arith.constant 0 : i32
    %c0_i32_1 = arith.constant 0 : i32
    return %c0_i32, %c0_i32_0 : i32, i32
  }
  func.func @transform_5(%arg0: i32) -> (i32, i32) {
    %c0_i32 = arith.constant 0 : i32
    %c0_i32_0 = arith.constant 0 : i32
    %c0_i32_1 = arith.constant 0 : i32
    return %c0_i32, %c0_i32_0 : i32, i32
  }
  func.func @transform_6(%arg0: i32) -> (i32, i32) {
    %c0_i32 = arith.constant 0 : i32
    %c0_i32_0 = arith.constant 0 : i32
    %c0_i32_1 = arith.constant 0 : i32
    return %c0_i32, %c0_i32_0 : i32, i32
  }
  func.func @transform_7(%arg0: i32) -> (i32, i32) {
    %c0_i32 = arith.constant 0 : i32
    %c0_i32_0 = arith.constant 0 : i32
    %c0_i32_1 = arith.constant 0 : i32
    return %c0_i32, %c0_i32_0 : i32, i32
  }
  func.func @transform_8(%arg0: i32) -> (i32, i32) {
    %c0_i32 = arith.constant 0 : i32
    %c0_i32_0 = arith.constant 0 : i32
    %c0_i32_1 = arith.constant 0 : i32
    return %c0_i32, %c0_i32_0 : i32, i32
  }
  func.func @transform_9(%arg0: i32) -> (i32, i32) {
    %c0_i32 = arith.constant 0 : i32
    %c0_i32_0 = arith.constant 0 : i32
    return %arg0, %c0_i32 : i32, i32
  }
  func.func @transform_10(%arg0: i32) -> (i32, i32) {
    %c0_i32 = arith.constant 0 : i32
    %c0_i32_0 = arith.constant 0 : i32
    return %arg0, %c0_i32 : i32, i32
  }
}

</mosaic_0001>

<bundles_post_ra>
// kernel: forward.1
= control target key start
LH: loop header
LB: loop body
LE: loop exit
PB: predicated region body
PF: predicated region fallthrough
CT: control target
= control target key end

     0   :  { %16 = vsyncpa [#allocation3], 0  ;;  %s3724_s0 = inlined_call_operand.vmem [shape: s32[16,16], index: 0, kind: input, shape index: {}]   ;;  %s3725_s1 = inlined_call_operand.vmem [shape: s32[16,1], index: 1, kind: input, shape index: {}]   ;;  %s3726_s2 = inlined_call_operand.hbm [shape: bf16[16,128,128], index: 2, kind: input, shape index: {}]   ;;  %s3727_s3 = inlined_call_operand.vmem [shape: f32[1,128], index: 3, kind: input, shape index: {}, may-alias: {3,5}]   ;;  %s3728_s4 = inlined_call_operand.hbm [shape: bf16[128,128], index: 4, kind: input, shape index: {}]   ;;  %s3729_s5 = inlined_call_operand.vmem [shape: f32[1,128], index: 5, kind: input, shape index: {}, may-alias: {3,5}]   ;;  %s3730_s6 = inlined_call_operand.vmem [shape: bf16[128,128], index: 6, kind: input, shape index: {}]   ;;  %s3731_s7 = inlined_call_operand.vmem [shape: f32[1,128], index: 7, kind: input, shape index: {}]   ;;  %s3732_s8 = inlined_call_operand.vmem [shape: f32[1,128], index: 8, kind: input, shape index: {}]   ;;  %s3733_s9 = inlined_call_operand.vmem [shape: bf16[16,128], index: 9, kind: output, shape index: {0}]   ;;  %s3734_s10 = inlined_call_operand.vmem [shape: f32[8,128], index: 10, kind: output, shape index: {1}]  }
   0x1   :  { %17 = vsyncpa [#allocation5], 0  ;;  %s3291_s13 = smov [#allocation2]   ;;  %s3243_s17 = scalar_lea.hbm %s3726_s2, 16384 }
   0x2   :  { %s27_s14 = sshll.u32 %s3291_s13, 4  ;;  %p3244_p0 = scmp.ne.s32.totalorder %s3726_s2, %s3243_s17  ;;  %s28_s14 = int_to_ptr.vmem [resolvable:$true] %s27_s14 }
   0x3   :  { %p3247_p1 = scmp.lt.u32.totalorder %s3243_s17, %s3726_s2 }
   0x5   :  { %p3249_p2 = pnand %p3247_p1, %p3244_p0 }
   0x7   :  { %3252 = shalt.err (!%p3249_p2)
}
   0x8   :  { %s3253_s22 = scalar_lea.vmem %s28_s14, 16384  ;;  %p3258_p4 = scmp.lt.s32.totalorder %s28_s14, %s28_s14 }
   0x9   :  { %p3254_p3 = scmp.ne.s32.totalorder %s28_s14, %s3253_s22  ;;  %p3259_p5 = scmp.lt.s32.totalorder %s3253_s22, %s3253_s22 }
   0xb   :  { %p3260_p6 = por %p3259_p5, %p3258_p4 }
   0xd   :  { %p3261_p7 = pnand %p3260_p6, %p3254_p3 }
   0xf   :  { %3264 = shalt.err (!%p3261_p7)
}
  0x10   :  { %s3292_s23 = smov 64   ;;  %s3293_s24 = smov 4  }
  0x11   :  { %33 = dma.hbm_to_vmem [thread:$0]  %s3726_s2, 16384, %s28_s14, [#allocation3], %s3292_s23, %s3292_s23, %s3293_s24  }
  0x12   :  { %s3294_s27 = smov [#allocation4]   ;;  %s3265_s11 = scalar_lea.hbm %s3728_s4, 1024 }
  0x13   :  { %s41_s28 = sshll.u32 %s3294_s27, 4  ;;  %p3266_p8 = scmp.ne.s32.totalorder %s3728_s4, %s3265_s11  ;;  %s42_s28 = int_to_ptr.vmem [resolvable:$true] %s41_s28 }
  0x14   :  { %p3269_p9 = scmp.lt.u32.totalorder %s3265_s11, %s3728_s4 }
  0x16   :  { %p3271_p10 = pnand %p3269_p9, %p3266_p8 }
  0x18   :  { %3274 = shalt.err (!%p3271_p10)
}
  0x19   :  { %s3275_s17 = scalar_lea.vmem %s42_s28, 1024  ;;  %p3280_p12 = scmp.lt.s32.totalorder %s42_s28, %s42_s28 }
  0x1a   :  { %p3276_p11 = scmp.ne.s32.totalorder %s42_s28, %s3275_s17  ;;  %p3281_p13 = scmp.lt.s32.totalorder %s3275_s17, %s3275_s17 }
  0x1c   :  { %p3282_p0 = por %p3281_p13, %p3280_p12 }
  0x1e   :  { %p3283_p1 = pnand %p3282_p0, %p3276_p11 }
  0x20   :  { %3286 = shalt.err (!%p3283_p1)
}
  0x21   :  { %47 = dma.hbm_to_vmem [thread:$0]  %s3728_s4, 1024, %s42_s28, [#allocation5], %s3292_s23, %s3292_s23, %s3293_s24  }
  0x22   :  { %3287 = dma.done.wait [#allocation3], 16384  }
  0x23   :  { %3288 = vsyncadd [#allocation3], 4294950912 }
  0x24   :  { %3289 = dma.done.wait [#allocation5], 1024  }
  0x25   :  { %3290 = vsyncadd [#allocation5], 4294966272  ;;  %v3295_v0 = vmov 1   ;;  %v3296_v1 = vmov 0   ;;  %v3297_v2 = vmov 0.0   ;;  %v3399_v3 = vld [vmem:[%s3724_s0] sm:$0xff]  ;;  %v65_v35 = vlaneseq }
  0x26   :  { %3059 = vset.pattern.permute.xlu0 %v3295_v0  ;;  %3060 = vset.pattern.permute.xlu1 %v3296_v1  ;;  %v3404_v4 = vld [vmem:[%s3724_s0 + $0x8] sm:$0xff]  ;;  %v3087_v5 = vld [vmem:[#allocation2 + $0x40] sm:$0xff]   ;;  %v3091_v9 = vld [vmem:[#allocation2 + $0x50] sm:$0xff]   ;;  %vm3298_vm0 = vmmov 0   ;;  %v3299_v11 = vmov 2   ;;  %v3300_v14 = vmov 3  }
  0x27   :  { %2672 = vmatprep.subr.bf16.mxu0 %v3297_v2  ;;  %2692 = vmatprep.subr.bf16.mxu1 %v3297_v2  ;;  %v3088_v6 = vld [vmem:[#allocation2] sm:$0xff]   ;;  %v3089_v7 = vld [vmem:[#allocation2 + $0x48] sm:$0xff]   ;;  %v3092_v10 = vld [vmem:[#allocation2 + $0x10] sm:$0xff]   ;;  %v3301_v17 = vmov 4   ;;  %v3302_v18 = vmov 5   ;;  %v3303_v21 = vmov 6  }
  0x28   :  { %68 = vperm.xlu1 %3060, %v3399_v3   ;;  %95 = vperm.xlu0 %3059, %v3399_v3   ;;  %v3090_v8 = vld [vmem:[#allocation2 + $0x8] sm:$0xff]   ;;  %v3093_v12 = vld [vmem:[#allocation2 + $0x58] sm:$0xff]   ;;  %v3095_v15 = vld [vmem:[#allocation2 + $0x60] sm:$0xff]   ;;  %v3304_v24 = vmov 8   ;;  %v3305_v27 = vmov 9   ;;  %v3306_v28 = vmov 7  }
  0x29   :  { %2673 = vmatpush3.bf16.msra.mxu0 %v3087_v5  ;;  %2693 = vmatpush3.bf16.msra.mxu1 %v3088_v6  ;;  %v3094_v13 = vld [vmem:[#allocation2 + $0x18] sm:$0xff]   ;;  %v3096_v16 = vld [vmem:[#allocation2 + $0x20] sm:$0xff]   ;;  %v3097_v19 = vld [vmem:[#allocation2 + $0x68] sm:$0xff]   ;;  %v3307_v29 = vmov 11   ;;  %v3308_v30 = vmov 10   ;;  %v3309_v31 = vmov 12  }
  0x2a   :  { %2674 = vmatprep.subr.bf16.mxu0 %v3297_v2  ;;  %2694 = vmatprep.subr.bf16.mxu1 %v3297_v2  ;;  %v3098_v20 = vld [vmem:[#allocation2 + $0x28] sm:$0xff]   ;;  %v3099_v22 = vld [vmem:[#allocation2 + $0x70] sm:$0xff]   ;;  %v3101_v25 = vld [vmem:[#allocation2 + $0x78] sm:$0xff]   ;;  %v3310_v32 = vmov 13   ;;  %v3311_v33 = vmov 14   ;;  %v3312_v34 = vmov 15  }
  0x2b   :  { %2688 = vmatprep.mubr.msk.bf16.mxu0 %vm3298_vm0, %v3297_v2  ;;  %2708 = vmatprep.mubr.msk.bf16.mxu1 %vm3298_vm0, %v3297_v2  ;;  %v3100_v23 = vld [vmem:[#allocation2 + $0x30] sm:$0xff]   ;;  %v3102_v26 = vld [vmem:[#allocation2 + $0x38] sm:$0xff]   ;;  %v3461_v38 = vand.u32 127, %v65_v35  ;;  %v3104_v41 = vld [vmem:[#allocation2 + $0xc0] sm:$0xff]   ;;  %v3313_v43 = vmov 1.0|1.0  }
  0x2c   :  { %71 = vperm.xlu1 %3060, %v3404_v4   ;;  %98 = vperm.xlu0 %3059, %v3404_v4   ;;  %v3103_v42 = vld [vmem:[#allocation2 + $0x80] sm:$0xff]   ;;  %v3106_v44 = vld [vmem:[#allocation2 + $0xc8] sm:$0xff]   ;;  %v3108_v46 = vld [vmem:[#allocation2 + $0xd0] sm:$0xff]  }
  0x2d   :  { %2675 = vmatpush3.bf16.msra.mxu0 %v3089_v7  ;;  %2695 = vmatpush3.bf16.msra.mxu1 %v3090_v8  ;;  %v3105_v45 = vld [vmem:[#allocation2 + $0x88] sm:$0xff]   ;;  %v3107_v47 = vld [vmem:[#allocation2 + $0x90] sm:$0xff]   ;;  %v3110_v48 = vld [vmem:[#allocation2 + $0xd8] sm:$0xff]  }
  0x2e   :  { %2676 = vmatprep.subr.bf16.mxu0 %v3297_v2  ;;  %2696 = vmatprep.subr.bf16.mxu1 %v3297_v2  ;;  %v3109_v49 = vld [vmem:[#allocation2 + $0x98] sm:$0xff]   ;;  %v3112_v50 = vld [vmem:[#allocation2 + $0xe0] sm:$0xff]   ;;  %v3114_v52 = vld [vmem:[#allocation2 + $0xe8] sm:$0xff]  }
  0x2f   :  { %v3111_v51 = vld [vmem:[#allocation2 + $0xa0] sm:$0xff]   ;;  %v3113_v55 = vld [vmem:[#allocation2 + $0xa8] sm:$0xff]   ;;  %v3115_v56 = vld [vmem:[#allocation2 + $0xf0] sm:$0xff]  }
  0x30   :  { %3062 = vset.pattern.permute.xlu1 %v3299_v11  ;;  %3061 = vset.pattern.permute.xlu0 %v3299_v11  ;;  %v3116_v57 = vld [vmem:[#allocation2 + $0xb0] sm:$0xff]   ;;  %v3117_v60 = vld [vmem:[#allocation2 + $0xf8] sm:$0xff]   ;;  %v3120_v62 = vld [vmem:[#allocation2 + $0x140] sm:$0xff]  }
  0x31   :  { %304 = vperm.xlu1 %3062, %v3404_v4   ;;  %301 = vperm.xlu0 %3061, %v3399_v3   ;;  %v3118_v61 = vld [vmem:[#allocation2 + $0xb8] sm:$0xff]   ;;  %v3119_v63 = vld [vmem:[#allocation2 + $0x100] sm:$0xff]   ;;  %v3122_v0 = vld [vmem:[#allocation2 + $0x148] sm:$0xff]  }
  0x32   :  { %2677 = vmatpush3.bf16.msra.mxu0 %v3091_v9  ;;  %2697 = vmatpush3.bf16.msra.mxu1 %v3092_v10  ;;  %v3126_v5 = vld [vmem:[#allocation2 + $0x158] sm:$0xff]   ;;  %v3128_v7 = vld [vmem:[#allocation2 + $0x160] sm:$0xff]   ;;  %v3130_v10 = vld [vmem:[#allocation2 + $0x168] sm:$0xff]  }
  0x33   :  { %2678 = vmatprep.subr.bf16.mxu0 %v3297_v2  ;;  %2698 = vmatprep.subr.bf16.mxu1 %v3297_v2  ;;  %v3125_v6 = vld [vmem:[#allocation2 + $0x118] sm:$0xff]   ;;  %v3127_v9 = vld [vmem:[#allocation2 + $0x120] sm:$0xff]   ;;  %v3129_v11 = vld [vmem:[#allocation2 + $0x128] sm:$0xff]  }
  0x35   :  { %3063 = vset.pattern.permute.xlu1 %v3300_v14  ;;  %3064 = vset.pattern.permute.xlu0 %v3300_v14  ;;  %v3131_v14 = vld [vmem:[#allocation2 + $0x130] sm:$0xff]  }
  0x36   :  { %420 = vperm.xlu1 %3063, %v3399_v3   ;;  %423 = vperm.xlu0 %3064, %v3404_v4  }
  0x37   :  { %2679 = vmatpush3.bf16.msra.mxu0 %v3093_v12  ;;  %2699 = vmatpush3.bf16.msra.mxu1 %v3094_v13  ;;  %v3132_v13 = vld [vmem:[#allocation2 + $0x170] sm:$0xff]  }
  0x38   :  { %2680 = vmatprep.subr.bf16.mxu0 %v3297_v2  ;;  %2700 = vmatprep.subr.bf16.mxu1 %v3297_v2 }
  0x3a   :  { %3065 = vset.pattern.permute.xlu1 %v3301_v17  ;;  %3066 = vset.pattern.permute.xlu0 %v3302_v18  ;;  %v3134_v17 = vld [vmem:[#allocation2 + $0x178] sm:$0xff]  }
  0x3b   :  { %539 = vperm.xlu1 %3065, %v3399_v3   ;;  %658 = vperm.xlu0 %3066, %v3399_v3  }
  0x3c   :  { %2681 = vmatpush3.bf16.msra.mxu0 %v3095_v15  ;;  %2701 = vmatpush3.bf16.msra.mxu1 %v3096_v16 }
  0x3d   :  { %2682 = vmatprep.subr.bf16.mxu0 %v3297_v2  ;;  %2702 = vmatprep.subr.bf16.mxu1 %v3297_v2 }
  0x3f   :  { %542 = vperm.xlu1 %3065, %v3404_v4   ;;  %3069 = vset.pattern.permute.xlu0 %v3303_v21 }
  0x40   :  { %780 = vperm.xlu0 %3069, %v3404_v4   ;;  %2683 = vmatpush3.bf16.msra.mxu0 %v3097_v19  ;;  %v3136_v19 = vld [vmem:[#allocation2 + $0x1c0] sm:$0xff]  }
  0x41   :  { %2703 = vmatpush3.bf16.msra.mxu1 %v3098_v20  ;;  %2684 = vmatprep.subr.bf16.mxu0 %v3297_v2  ;;  %v3135_v20 = vld [vmem:[#allocation2 + $0x180] sm:$0xff]  }
  0x42   :  { %2704 = vmatprep.subr.bf16.mxu1 %v3297_v2 }
  0x43   :  { %3067 = vset.pattern.permute.xlu1 %v3302_v18  ;;  %v3133_v18 = vld [vmem:[#allocation2 + $0x138] sm:$0xff]  }
  0x44   :  { %661 = vperm.xlu1 %3067, %v3404_v4   ;;  %3071 = vset.pattern.permute.xlu0 %v3304_v24 }
  0x45   :  { %2685 = vmatpush3.bf16.msra.mxu0 %v3099_v22  ;;  %2705 = vmatpush3.bf16.msra.mxu1 %v3100_v23  ;;  %v3137_v22 = vld [vmem:[#allocation2 + $0x188] sm:$0xff]   ;;  %v3140_v23 = vld [vmem:[#allocation2 + $0x1d0] sm:$0xff]  }
  0x46   :  { %1015 = vperm.xlu0 %3071, %v3399_v3   ;;  %2686 = vmatprep.subr.bf16.mxu0 %v3297_v2 }
  0x47   :  { %2706 = vmatprep.subr.bf16.mxu1 %v3297_v2 }
  0x48   :  { %3068 = vset.pattern.permute.xlu1 %v3303_v21  ;;  %v3138_v21 = vld [vmem:[#allocation2 + $0x1c8] sm:$0xff]  }
  0x49   :  { %777 = vperm.xlu1 %3068, %v3399_v3   ;;  %2687 = vmatpush3.bf16.msra.mxu0 %v3101_v25  ;;  %v3142_v25 = vld [vmem:[#allocation2 + $0x1d8] sm:$0xff]  }
  0x4a   :  { %2707 = vmatpush3.bf16.msra.mxu1 %v3102_v26  ;;  %3074 = vset.pattern.permute.xlu0 %v3305_v27  ;;  %v3141_v26 = vld [vmem:[#allocation2 + $0x198] sm:$0xff]  }
  0x4b   :  { %1137 = vperm.xlu0 %3074, %v3404_v4   ;;  %2712 = vmatprep.subr.bf16.mxu0 %v3297_v2 }
  0x4c   :  { %2732 = vmatprep.subr.bf16.mxu1 %v3297_v2 }
  0x4d   :  { %3070 = vset.pattern.permute.xlu1 %v3306_v28  ;;  %v3144_v28 = vld [vmem:[#allocation2 + $0x1e0] sm:$0xff]  }
  0x4e   :  { %896 = vperm.xlu1 %3070, %v3399_v3  }
  0x4f   :  { %3076 = vset.pattern.permute.xlu0 %v3307_v29 }
  0x50   :  { %1372 = vperm.xlu0 %3076, %v3399_v3  }
  0x52   :  { %899 = vperm.xlu1 %3070, %v3404_v4  }
  0x54   :  { %3079 = vset.pattern.permute.xlu0 %v3309_v31 }
  0x55   :  { %1494 = vperm.xlu0 %3079, %v3404_v4  }
  0x56   :  { %3072 = vset.pattern.permute.xlu1 %v3304_v24  ;;  %v3139_v24 = vld [vmem:[#allocation2 + $0x190] sm:$0xff]  }
  0x57   :  { %1018 = vperm.xlu1 %3072, %v3404_v4  }
  0x59   :  { %3081 = vset.pattern.permute.xlu0 %v3311_v33 }
  0x5a   :  { %1729 = vperm.xlu0 %3081, %v3399_v3  }
  0x5b   :  { %3073 = vset.pattern.permute.xlu1 %v3305_v27 }
  0x5c   :  { %1134 = vperm.xlu1 %3073, %v3399_v3  }
  0x5e   :  { %3084 = vset.pattern.permute.xlu0 %v3312_v34 }
  0x5f   :  { %1851 = vperm.xlu0 %3084, %v3404_v4  }
  0x60   :  { %3075 = vset.pattern.permute.xlu1 %v3308_v30  ;;  %v3146_v30 = vld [vmem:[#allocation2 + $0x1e8] sm:$0xff]  }
  0x61   :  { %1253 = vperm.xlu1 %3075, %v3399_v3  }
  0x63   :  { %3086 = vset.pattern.permute.xlu0 %v3296_v1 }
  0x65   :  { %1256 = vperm.xlu1 %3075, %v3404_v4  }
  0x69   :  { %3077 = vset.pattern.permute.xlu1 %v3307_v29  ;;  %v3143_v29 = vld [vmem:[#allocation2 + $0x1a0] sm:$0xff]  }
  0x6a   :  { %1375 = vperm.xlu1 %3077, %v3404_v4  }
  0x6e   :  { %3078 = vset.pattern.permute.xlu1 %v3309_v31 }
  0x6f   :  { %1491 = vperm.xlu1 %3078, %v3399_v3  }
  0x73   :  { %3080 = vset.pattern.permute.xlu1 %v3310_v32  ;;  %v3145_v32 = vld [vmem:[#allocation2 + $0x1a8] sm:$0xff]  }
  0x74   :  { %1610 = vperm.xlu1 %3080, %v3399_v3  }
  0x78   :  { %1613 = vperm.xlu1 %3080, %v3404_v4  }
  0x7c   :  { %3082 = vset.pattern.permute.xlu1 %v3311_v33  ;;  %v3148_v33 = vld [vmem:[#allocation2 + $0x1f0] sm:$0xff]  }
  0x7d   :  { %1732 = vperm.xlu1 %3082, %v3404_v4   ;;  %v3123_v4 = vld [vmem:[#allocation2 + $0x110] sm:$0xff]  }
  0x81   :  { %3083 = vset.pattern.permute.xlu1 %v3312_v34  ;;  %v3147_v34 = vld [vmem:[#allocation2 + $0x1b0] sm:$0xff]  }
  0x82   :  { %1848 = vperm.xlu1 %3083, %v3399_v3   ;;  %v3124_v3 = vld [vmem:[#allocation2 + $0x150] sm:$0xff]  }
  0x86   :  { %3085 = vset.pattern.permute.xlu1 %v3296_v1  ;;  %v3121_v1 = vld [vmem:[#allocation2 + $0x108] sm:$0xff]  }
  0xa7   :  { %v69_v36 = vpop.permute.xlu1 %68  ;;  %v96_v37 = vpop.permute.xlu0 %95 }
  0xa8   :  { %vm73_vm1 = vcmp.eq.s32.totalorder %v3461_v38, %v69_v36  ;;  %vm100_vm4 = vcmp.eq.s32.totalorder %v3461_v38, %v96_v37  ;;  %v3150_v37 = vld [vmem:[#allocation2 + $0x1f8] sm:$0xff]  }
  0xab   :  { %v72_v39 = vpop.permute.xlu1 %71  ;;  %v99_v40 = vpop.permute.xlu0 %98 }
  0xac   :  { %vm74_vm2 = vcmp.eq.s32.totalorder %v3461_v38, %v72_v39  ;;  %vm101_vm3 = vcmp.eq.s32.totalorder %v3461_v38, %v99_v40  ;;  %v3149_v40 = vld [vmem:[#allocation2 + $0x1b8] sm:$0xff]  }
  0xad   :  { %vm2339_vm5 = vmpackc.low %vm74_vm2, %vm73_vm1 }
  0xae   :  { %vm2329_vm6 = vmpackc.low %vm101_vm3, %vm100_vm4  ;;  %2709 = vmatmul.mubr.msk.bf16.vlgmr.msra.gmra.mrb[0].mxu1 %vm2339_vm5, %v3313_v43 }
  0xaf   :  { %2689 = vmatmul.mubr.msk.bf16.vlgmr.msra.gmra.mrb[0].mxu0 %vm2329_vm6, %v3313_v43  ;;  %2733 = vmatpush3.bf16.msra.mxu1 %v3104_v41  ;;  %v3152_v41 = vld [vmem:[#allocation2 + $0x240] sm:$0xff]  }
  0xb0   :  { %2713 = vmatpush3.bf16.msra.mxu0 %v3103_v42  ;;  %2734 = vmatprep.subr.bf16.mxu1 %v3297_v2  ;;  %v305_v53 = vpop.permute.xlu1 %304  ;;  %v302_v54 = vpop.permute.xlu0 %301  ;;  %v3151_v42 = vld [vmem:[#allocation2 + $0x200] sm:$0xff]  }
  0xb1   :  { %2714 = vmatprep.subr.bf16.mxu0 %v3297_v2  ;;  %2728 = vmatprep.mubr.msk.bf16.mxu0 %vm3298_vm0, %v3297_v2  ;;  %vm307_vm9 = vcmp.eq.s32.totalorder %v3461_v38, %v305_v53  ;;  %vm306_vm10 = vcmp.eq.s32.totalorder %v3461_v38, %v302_v54 }
  0xb2   :  { %2748 = vmatprep.mubr.msk.bf16.mxu1 %vm3298_vm0, %v3297_v2  ;;  %vm2349_vm12 = vmpackc.low %vm307_vm9, %vm306_vm10 }
  0xb3   :  { %2735 = vmatpush3.bf16.msra.mxu1 %v3106_v44  ;;  %v3154_v44 = vld [vmem:[#allocation2 + $0x248] sm:$0xff]  }
  0xb4   :  { %2715 = vmatpush3.bf16.msra.mxu0 %v3105_v45  ;;  %2736 = vmatprep.subr.bf16.mxu1 %v3297_v2  ;;  %v3153_v45 = vld [vmem:[#allocation2 + $0x208] sm:$0xff]  }
  0xb5   :  { %2716 = vmatprep.subr.bf16.mxu0 %v3297_v2  ;;  %v421_v58 = vpop.permute.xlu1 %420  ;;  %v424_v59 = vpop.permute.xlu0 %423 }
  0xb6   :  { %vm425_vm7 = vcmp.eq.s32.totalorder %v3461_v38, %v421_v58  ;;  %vm426_vm8 = vcmp.eq.s32.totalorder %v3461_v38, %v424_v59 }
  0xb7   :  { %2737 = vmatpush3.bf16.msra.mxu1 %v3108_v46  ;;  %vm2359_vm11 = vmpackc.low %vm426_vm8, %vm425_vm7  ;;  %v3156_v46 = vld [vmem:[#allocation2 + $0x250] sm:$0xff]  }
  0xb8   :  { %2717 = vmatpush3.bf16.msra.mxu0 %v3107_v47  ;;  %2738 = vmatprep.subr.bf16.mxu1 %v3297_v2  ;;  %v3155_v47 = vld [vmem:[#allocation2 + $0x210] sm:$0xff]  }
  0xb9   :  { %2718 = vmatprep.subr.bf16.mxu0 %v3297_v2 }
  0xba   :  { %v540_v8 = vpop.permute.xlu1 %539  ;;  %v659_v16 = vpop.permute.xlu0 %658 }
  0xbb   :  { %2739 = vmatpush3.bf16.msra.mxu1 %v3110_v48  ;;  %vm663_vm14 = vcmp.eq.s32.totalorder %v3461_v38, %v659_v16  ;;  %vm544_vm15 = vcmp.eq.s32.totalorder %v3461_v38, %v540_v8  ;;  %v3158_v48 = vld [vmem:[#allocation2 + $0x258] sm:$0xff]  }
  0xbc   :  { %2719 = vmatpush3.bf16.msra.mxu0 %v3109_v49  ;;  %2740 = vmatprep.subr.bf16.mxu1 %v3297_v2  ;;  %v3157_v49 = vld [vmem:[#allocation2 + $0x218] sm:$0xff]  }
  0xbd   :  { %2720 = vmatprep.subr.bf16.mxu0 %v3297_v2 }
  0xbe   :  { %v543_v12 = vpop.permute.xlu1 %542 }
  0xbf   :  { %2741 = vmatpush3.bf16.msra.mxu1 %v3112_v50  ;;  %vm545_vm1 = vcmp.eq.s32.totalorder %v3461_v38, %v543_v12  ;;  %v781_v39 = vpop.permute.xlu0 %780  ;;  %v3160_v50 = vld [vmem:[#allocation2 + $0x260] sm:$0xff]  }
  0xc0   :  { %2721 = vmatpush3.bf16.msra.mxu0 %v3111_v51  ;;  %2742 = vmatprep.subr.bf16.mxu1 %v3297_v2  ;;  %vm2369_vm3 = vmpackc.low %vm545_vm1, %vm544_vm15  ;;  %vm783_vm7 = vcmp.eq.s32.totalorder %v3461_v38, %v781_v39  ;;  %v3159_v51 = vld [vmem:[#allocation2 + $0x220] sm:$0xff]  }
  0xc1   :  { %2722 = vmatprep.subr.bf16.mxu0 %v3297_v2 }
  0xc3   :  { %2743 = vmatpush3.bf16.msra.mxu1 %v3114_v52  ;;  %v662_v15 = vpop.permute.xlu1 %661  ;;  %v3162_v52 = vld [vmem:[#allocation2 + $0x268] sm:$0xff]  }
  0xc4   :  { %2723 = vmatpush3.bf16.msra.mxu0 %v3113_v55  ;;  %2744 = vmatprep.subr.bf16.mxu1 %v3297_v2  ;;  %vm664_vm13 = vcmp.eq.s32.totalorder %v3461_v38, %v662_v15  ;;  %v3161_v55 = vld [vmem:[#allocation2 + $0x228] sm:$0xff]  }
  0xc5   :  { %2724 = vmatprep.subr.bf16.mxu0 %v3297_v2  ;;  %vm2379_vm2 = vmpackc.low %vm664_vm13, %vm663_vm14  ;;  %v1016_v54 = vpop.permute.xlu0 %1015 }
  0xc6   :  { %vm1020_vm13 = vcmp.eq.s32.totalorder %v3461_v38, %v1016_v54 }
  0xc7   :  { %2745 = vmatpush3.bf16.msra.mxu1 %v3115_v56  ;;  %v3164_v56 = vld [vmem:[#allocation2 + $0x270] sm:$0xff]  }
  0xc8   :  { %2725 = vmatpush3.bf16.msra.mxu0 %v3116_v57  ;;  %2746 = vmatprep.subr.bf16.mxu1 %v3297_v2  ;;  %v778_v27 = vpop.permute.xlu1 %777  ;;  %v3163_v57 = vld [vmem:[#allocation2 + $0x230] sm:$0xff]  }
  0xc9   :  { %2726 = vmatprep.subr.bf16.mxu0 %v3297_v2  ;;  %vm782_vm6 = vcmp.eq.s32.totalorder %v3461_v38, %v778_v27 }
  0xca   :  { %vm2389_vm9 = vmpackc.low %vm783_vm7, %vm782_vm6  ;;  %v1138_v59 = vpop.permute.xlu0 %1137 }
  0xcb   :  { %2747 = vmatpush3.bf16.msra.mxu1 %v3117_v60  ;;  %v3166_v60 = vld [vmem:[#allocation2 + $0x278] sm:$0xff]  }
  0xcc   :  { %2727 = vmatpush3.bf16.msra.mxu0 %v3118_v61  ;;  %2772 = vmatprep.subr.bf16.mxu1 %v3297_v2  ;;  %v3165_v61 = vld [vmem:[#allocation2 + $0x238] sm:$0xff]  }
  0xcd   :  { %2752 = vmatprep.subr.bf16.mxu0 %v3297_v2  ;;  %v897_v31 = vpop.permute.xlu1 %896 }
  0xce   :  { %2749 = vmatmul.mubr.msk.bf16.vlgmr.msra.gmra.mrb[4].mxu1 %vm2359_vm11, %v3313_v43  ;;  %vm901_vm4 = vcmp.eq.s32.totalorder %v3461_v38, %v897_v31  ;;  %vm1140_vm11 = vcmp.eq.s32.totalorder %v3461_v38, %v1138_v59 }
  0xcf   :  { %2729 = vmatmul.mubr.msk.bf16.vlgmr.msra.gmra.mrb[4].mxu0 %vm2349_vm12, %v3313_v43  ;;  %2773 = vmatpush3.bf16.msra.mxu1 %v3120_v62  ;;  %v3168_v62 = vld [vmem:[#allocation2 + $0x2c0] sm:$0xff]   ;;  %v1373_v16 = vpop.permute.xlu0 %1372 }
  0xd0   :  { %2753 = vmatpush3.bf16.msra.mxu0 %v3119_v63  ;;  %2774 = vmatprep.subr.bf16.mxu1 %v3297_v2  ;;  %v3167_v63 = vld [vmem:[#allocation2 + $0x280] sm:$0xff]  }
  0xd1   :  { %2754 = vmatprep.subr.bf16.mxu0 %v3297_v2  ;;  %2768 = vmatprep.mubr.msk.bf16.mxu0 %vm3298_vm0, %v3297_v2  ;;  %v900_v36 = vpop.permute.xlu1 %899 }
  0xd2   :  { %2788 = vmatprep.mubr.msk.bf16.mxu1 %vm3298_vm0, %v3297_v2  ;;  %vm902_vm5 = vcmp.eq.s32.totalorder %v3461_v38, %v900_v36 }
  0xd3   :  { %2775 = vmatpush3.bf16.msra.mxu1 %v3122_v0  ;;  %vm2399_vm8 = vmpackc.low %vm902_vm5, %vm901_vm4  ;;  %v3170_v0 = vld [vmem:[#allocation2 + $0x2c8] sm:$0xff]  }
  0xd4   :  { %2755 = vmatpush3.bf16.msra.mxu0 %v3121_v1  ;;  %2776 = vmatprep.subr.bf16.mxu1 %v3297_v2  ;;  %v3169_v1 = vld [vmem:[#allocation2 + $0x288] sm:$0xff]   ;;  %v1495_v39 = vpop.permute.xlu0 %1494 }
  0xd5   :  { %2756 = vmatprep.subr.bf16.mxu0 %v3297_v2 }
  0xd6   :  { %v1019_v53 = vpop.permute.xlu1 %1018 }
  0xd7   :  { %2777 = vmatpush3.bf16.msra.mxu1 %v3124_v3  ;;  %vm1021_vm12 = vcmp.eq.s32.totalorder %v3461_v38, %v1019_v53  ;;  %v3172_v3 = vld [vmem:[#allocation2 + $0x2d0] sm:$0xff]   ;;  %v3210_v53 = vld [vmem:[#allocation2 + $0x3e8] sm:$0xff]  }
  0xd8   :  { %2757 = vmatpush3.bf16.msra.mxu0 %v3123_v4  ;;  %2778 = vmatprep.subr.bf16.mxu1 %v3297_v2  ;;  %vm2409_vm15 = vmpackc.low %vm1021_vm12, %vm1020_vm13  ;;  %v3171_v4 = vld [vmem:[#allocation2 + $0x290] sm:$0xff]  }
  0xd9   :  { %2758 = vmatprep.subr.bf16.mxu0 %v3297_v2  ;;  %v1730_v54 = vpop.permute.xlu0 %1729 }
  0xdb   :  { %2779 = vmatpush3.bf16.msra.mxu1 %v3126_v5  ;;  %v1135_v58 = vpop.permute.xlu1 %1134  ;;  %v3174_v5 = vld [vmem:[#allocation2 + $0x2d8] sm:$0xff]  }
  0xdc   :  { %2759 = vmatpush3.bf16.msra.mxu0 %v3125_v6  ;;  %2780 = vmatprep.subr.bf16.mxu1 %v3297_v2  ;;  %vm1139_vm10 = vcmp.eq.s32.totalorder %v3461_v38, %v1135_v58  ;;  %v3173_v6 = vld [vmem:[#allocation2 + $0x298] sm:$0xff]  }
  0xdd   :  { %2760 = vmatprep.subr.bf16.mxu0 %v3297_v2  ;;  %vm2419_vm14 = vmpackc.low %vm1140_vm11, %vm1139_vm10  ;;  %vm1497_vm10 = vcmp.eq.s32.totalorder %v3461_v38, %v1495_v39 }
  0xdf   :  { %2781 = vmatpush3.bf16.msra.mxu1 %v3128_v7  ;;  %v3176_v7 = vld [vmem:[#allocation2 + $0x2e0] sm:$0xff]  }
  0xe0   :  { %2761 = vmatpush3.bf16.msra.mxu0 %v3127_v9  ;;  %2782 = vmatprep.subr.bf16.mxu1 %v3297_v2  ;;  %v1254_v8 = vpop.permute.xlu1 %1253  ;;  %v3175_v9 = vld [vmem:[#allocation2 + $0x2a0] sm:$0xff]  }
  0xe1   :  { %2762 = vmatprep.subr.bf16.mxu0 %v3297_v2 }
  0xe3   :  { %2783 = vmatpush3.bf16.msra.mxu1 %v3130_v10  ;;  %v3178_v10 = vld [vmem:[#allocation2 + $0x2e8] sm:$0xff]  }
  0xe4   :  { %2763 = vmatpush3.bf16.msra.mxu0 %v3129_v11  ;;  %2784 = vmatprep.subr.bf16.mxu1 %v3297_v2  ;;  %v3177_v11 = vld [vmem:[#allocation2 + $0x2a8] sm:$0xff]   ;;  %v1257_v12 = vpop.permute.xlu1 %1256 }
  0xe5   :  { %2764 = vmatprep.subr.bf16.mxu0 %v3297_v2  ;;  %vm1259_vm4 = vcmp.eq.s32.totalorder %v3461_v38, %v1257_v12 }
  0xe7   :  { %2785 = vmatpush3.bf16.msra.mxu1 %v3132_v13  ;;  %v3180_v13 = vld [vmem:[#allocation2 + $0x2f0] sm:$0xff]  }
  0xe8   :  { %2765 = vmatpush3.bf16.msra.mxu0 %v3131_v14  ;;  %2786 = vmatprep.subr.bf16.mxu1 %v3297_v2  ;;  %v3179_v14 = vld [vmem:[#allocation2 + $0x2b0] sm:$0xff]  }
  0xe9   :  { %2766 = vmatprep.subr.bf16.mxu0 %v3297_v2  ;;  %v1376_v15 = vpop.permute.xlu1 %1375 }
  0xea   :  { %vm1378_vm1 = vcmp.eq.s32.totalorder %v3461_v38, %v1376_v15 }
  0xeb   :  { %2787 = vmatpush3.bf16.msra.mxu1 %v3134_v17  ;;  %v3182_v17 = vld [vmem:[#allocation2 + $0x2f8] sm:$0xff]  }
  0xec   :  { %2767 = vmatpush3.bf16.msra.mxu0 %v3133_v18  ;;  %2812 = vmatprep.subr.bf16.mxu1 %v3297_v2  ;;  %v3181_v18 = vld [vmem:[#allocation2 + $0x2b8] sm:$0xff]  }
  0xed   :  { %2792 = vmatprep.subr.bf16.mxu0 %v3297_v2 }
  0xee   :  { %2789 = vmatmul.mubr.msk.bf16.vlgmr.msra.gmra.mrb[8].mxu1 %vm2379_vm2, %v3313_v43  ;;  %vm1377_vm2 = vcmp.eq.s32.totalorder %v3461_v38, %v1373_v16  ;;  %v1492_v27 = vpop.permute.xlu1 %1491 }
  0xef   :  { %2769 = vmatmul.mubr.msk.bf16.vlgmr.msra.gmra.mrb[8].mxu0 %vm2369_vm3, %v3313_v43  ;;  %2813 = vmatpush3.bf16.msra.mxu1 %v3136_v19  ;;  %vm1258_vm3 = vcmp.eq.s32.totalorder %v3461_v38, %v1254_v8  ;;  %vm2439_vm5 = vmpackc.low %vm1378_vm1, %vm1377_vm2  ;;  %v3184_v19 = vld [vmem:[#allocation2 + $0x340] sm:$0xff]   ;;  %v3213_v8 = vld [vmem:[#allocation2 + $0x3b8] sm:$0xff]   ;;  %vm1734_vm1 = vcmp.eq.s32.totalorder %v3461_v38, %v1730_v54 }
  0xf0   :  { %2793 = vmatpush3.bf16.msra.mxu0 %v3135_v20  ;;  %2814 = vmatprep.subr.bf16.mxu1 %v3297_v2  ;;  %v3183_v20 = vld [vmem:[#allocation2 + $0x300] sm:$0xff]   ;;  %vm2429_vm6 = vmpackc.low %vm1259_vm4, %vm1258_vm3  ;;  %v3222_v54 = vld [vmem:[#allocation4 + $0x38] sm:$0xff]  }
  0xf1   :  { %2794 = vmatprep.subr.bf16.mxu0 %v3297_v2  ;;  %2808 = vmatprep.mubr.msk.bf16.mxu0 %vm3298_vm0, %v3297_v2 }
  0xf2   :  { %2828 = vmatprep.mubr.msk.bf16.mxu1 %vm3298_vm0, %v3297_v2 }
  0xf3   :  { %2815 = vmatpush3.bf16.msra.mxu1 %v3138_v21  ;;  %v3186_v21 = vld [vmem:[#allocation2 + $0x348] sm:$0xff]   ;;  %v1611_v31 = vpop.permute.xlu1 %1610 }
  0xf4   :  { %2795 = vmatpush3.bf16.msra.mxu0 %v3137_v22  ;;  %2816 = vmatprep.subr.bf16.mxu1 %v3297_v2  ;;  %v3185_v22 = vld [vmem:[#allocation2 + $0x308] sm:$0xff]   ;;  %vm1615_vm7 = vcmp.eq.s32.totalorder %v3461_v38, %v1611_v31 }
  0xf5   :  { %2796 = vmatprep.subr.bf16.mxu0 %v3297_v2 }
  0xf7   :  { %2817 = vmatpush3.bf16.msra.mxu1 %v3140_v23  ;;  %v3188_v23 = vld [vmem:[#allocation2 + $0x350] sm:$0xff]   ;;  %v1614_v36 = vpop.permute.xlu1 %1613 }
  0xf8   :  { %2797 = vmatpush3.bf16.msra.mxu0 %v3139_v24  ;;  %2818 = vmatprep.subr.bf16.mxu1 %v3297_v2  ;;  %v3187_v24 = vld [vmem:[#allocation2 + $0x310] sm:$0xff]  }
  0xf9   :  { %2798 = vmatprep.subr.bf16.mxu0 %v3297_v2 }
  0xfb   :  { %2819 = vmatpush3.bf16.msra.mxu1 %v3142_v25  ;;  %v3190_v25 = vld [vmem:[#allocation2 + $0x358] sm:$0xff]  }
  0xfc   :  { %2799 = vmatpush3.bf16.msra.mxu0 %v3141_v26  ;;  %2820 = vmatprep.subr.bf16.mxu1 %v3297_v2  ;;  %v3189_v26 = vld [vmem:[#allocation2 + $0x318] sm:$0xff]  }
  0xfd   :  { %2800 = vmatprep.subr.bf16.mxu0 %v3297_v2 }
  0xff   :  { %2821 = vmatpush3.bf16.msra.mxu1 %v3144_v28  ;;  %v3192_v28 = vld [vmem:[#allocation2 + $0x360] sm:$0xff]  }
 0x100   :  { %2801 = vmatpush3.bf16.msra.mxu0 %v3143_v29  ;;  %2822 = vmatprep.subr.bf16.mxu1 %v3297_v2  ;;  %v3191_v29 = vld [vmem:[#allocation2 + $0x320] sm:$0xff]  }
 0x101   :  { %2802 = vmatprep.subr.bf16.mxu0 %v3297_v2 }
 0x103   :  { %2823 = vmatpush3.bf16.msra.mxu1 %v3146_v30  ;;  %v3194_v30 = vld [vmem:[#allocation2 + $0x368] sm:$0xff]  }
 0x104   :  { %2803 = vmatpush3.bf16.msra.mxu0 %v3145_v32  ;;  %2824 = vmatprep.subr.bf16.mxu1 %v3297_v2  ;;  %v3193_v32 = vld [vmem:[#allocation2 + $0x328] sm:$0xff]  }
 0x105   :  { %2804 = vmatprep.subr.bf16.mxu0 %v3297_v2 }
 0x107   :  { %2825 = vmatpush3.bf16.msra.mxu1 %v3148_v33  ;;  %v3196_v33 = vld [vmem:[#allocation2 + $0x370] sm:$0xff]  }
 0x108   :  { %2805 = vmatpush3.bf16.msra.mxu0 %v3147_v34  ;;  %2826 = vmatprep.subr.bf16.mxu1 %v3297_v2  ;;  %v3195_v34 = vld [vmem:[#allocation2 + $0x330] sm:$0xff]  }
 0x109   :  { %2806 = vmatprep.subr.bf16.mxu0 %v3297_v2 }
 0x10b   :  { %2827 = vmatpush3.bf16.msra.mxu1 %v3150_v37  ;;  %v3198_v37 = vld [vmem:[#allocation2 + $0x378] sm:$0xff]  }
 0x10c   :  { %2807 = vmatpush3.bf16.msra.mxu0 %v3149_v40  ;;  %2852 = vmatprep.subr.bf16.mxu1 %v3297_v2  ;;  %v3197_v40 = vld [vmem:[#allocation2 + $0x338] sm:$0xff]  }
 0x10d   :  { %2832 = vmatprep.subr.bf16.mxu0 %v3297_v2 }
 0x10e   :  { %2829 = vmatmul.mubr.msk.bf16.vlgmr.msra.gmra.mrb[12].mxu1 %vm2399_vm8, %v3313_v43  ;;  %vm1616_vm8 = vcmp.eq.s32.totalorder %v3461_v38, %v1614_v36  ;;  %v3218_v36 = vld [vmem:[#allocation4 + $0x18] sm:$0xff]  }
 0x10f   :  { %2809 = vmatmul.mubr.msk.bf16.vlgmr.msra.gmra.mrb[12].mxu0 %vm2389_vm9, %v3313_v43  ;;  %2853 = vmatpush3.bf16.msra.mxu1 %v3152_v41  ;;  %vm1496_vm9 = vcmp.eq.s32.totalorder %v3461_v38, %v1492_v27  ;;  %vm2459_vm11 = vmpackc.low %vm1616_vm8, %vm1615_vm7  ;;  %v3200_v41 = vld [vmem:[#allocation2 + $0x3c0] sm:$0xff]   ;;  %vm2302_vm7 = vcmp.eq.s32.totalorder %v3461_v38, 0  ;;  %vm2306_vm8 = vcmp.eq.s32.totalorder %v3461_v38, 1 }
 0x110   :  { %2833 = vmatpush3.bf16.msra.mxu0 %v3151_v42  ;;  %2854 = vmatprep.subr.bf16.mxu1 %v3297_v2  ;;  %v3199_v42 = vld [vmem:[#allocation2 + $0x380] sm:$0xff]   ;;  %vm2449_vm12 = vmpackc.low %vm1497_vm10, %vm1496_vm9 }
 0x111   :  { %2834 = vmatprep.subr.bf16.mxu0 %v3297_v2  ;;  %2848 = vmatprep.mubr.msk.bf16.mxu0 %vm3298_vm0, %v3297_v2 }
 0x112   :  { %2868 = vmatprep.mubr.msk.bf16.mxu1 %vm3298_vm0, %v3297_v2 }
 0x113   :  { %2855 = vmatpush3.bf16.msra.mxu1 %v3154_v44  ;;  %v3202_v44 = vld [vmem:[#allocation2 + $0x3c8] sm:$0xff]  }
 0x114   :  { %2835 = vmatpush3.bf16.msra.mxu0 %v3153_v45  ;;  %2856 = vmatprep.subr.bf16.mxu1 %v3297_v2  ;;  %v3201_v45 = vld [vmem:[#allocation2 + $0x388] sm:$0xff]  }
 0x115   :  { %2836 = vmatprep.subr.bf16.mxu0 %v3297_v2 }
 0x117   :  { %2857 = vmatpush3.bf16.msra.mxu1 %v3156_v46  ;;  %v3204_v46 = vld [vmem:[#allocation2 + $0x3d0] sm:$0xff]  }
 0x118   :  { %2837 = vmatpush3.bf16.msra.mxu0 %v3155_v47  ;;  %2858 = vmatprep.subr.bf16.mxu1 %v3297_v2  ;;  %v3203_v47 = vld [vmem:[#allocation2 + $0x390] sm:$0xff]  }
 0x119   :  { %2838 = vmatprep.subr.bf16.mxu0 %v3297_v2 }
 0x11b   :  { %2859 = vmatpush3.bf16.msra.mxu1 %v3158_v48  ;;  %v3206_v48 = vld [vmem:[#allocation2 + $0x3d8] sm:$0xff]  }
 0x11c   :  { %2839 = vmatpush3.bf16.msra.mxu0 %v3157_v49  ;;  %2860 = vmatprep.subr.bf16.mxu1 %v3297_v2  ;;  %v3205_v49 = vld [vmem:[#allocation2 + $0x398] sm:$0xff]  }
 0x11d   :  { %2840 = vmatprep.subr.bf16.mxu0 %v3297_v2 }
 0x11f   :  { %2861 = vmatpush3.bf16.msra.mxu1 %v3160_v50  ;;  %v3208_v50 = vld [vmem:[#allocation2 + $0x3e0] sm:$0xff]  }
 0x120   :  { %2841 = vmatpush3.bf16.msra.mxu0 %v3159_v51  ;;  %2862 = vmatprep.subr.bf16.mxu1 %v3297_v2  ;;  %v1733_v51 = vpop.permute.xlu1 %1732 }
 0x121   :  { %2842 = vmatprep.subr.bf16.mxu0 %v3297_v2 }
 0x123   :  { %2863 = vmatpush3.bf16.msra.mxu1 %v3162_v52  ;;  %v3207_v52 = vld [vmem:[#allocation2 + $0x3a0] sm:$0xff]  }
 0x124   :  { %2843 = vmatpush3.bf16.msra.mxu0 %v3161_v55  ;;  %2864 = vmatprep.subr.bf16.mxu1 %v3297_v2  ;;  %v3209_v55 = vld [vmem:[#allocation2 + $0x3a8] sm:$0xff]  }
 0x125   :  { %2844 = vmatprep.subr.bf16.mxu0 %v3297_v2 }
 0x127   :  { %2865 = vmatpush3.bf16.msra.mxu1 %v3164_v56 }
 0x128   :  { %2845 = vmatpush3.bf16.msra.mxu0 %v3163_v57  ;;  %2866 = vmatprep.subr.bf16.mxu1 %v3297_v2  ;;  %v1849_v57 = vpop.permute.xlu1 %1848 }
 0x129   :  { %2846 = vmatprep.subr.bf16.mxu0 %v3297_v2  ;;  %vm1853_vm13 = vcmp.eq.s32.totalorder %v3461_v38, %v1849_v57  ;;  %v3225_v57 = vld [vmem:[%s3730_s6 + $0x10] sm:$0xff]  }
 0x12b   :  { %2867 = vmatpush3.bf16.msra.mxu1 %v3166_v60 }
 0x12c   :  { %2847 = vmatpush3.bf16.msra.mxu0 %v3165_v61  ;;  %2892 = vmatprep.subr.bf16.mxu1 %v3297_v2 }
 0x12d   :  { %2872 = vmatprep.subr.bf16.mxu0 %v3297_v2 }
 0x12e   :  { %2869 = vmatmul.mubr.msk.bf16.vlgmr.msra.gmra.mrb[16].mxu1 %vm2419_vm14, %v3313_v43 }
 0x12f   :  { %2849 = vmatmul.mubr.msk.bf16.vlgmr.msra.gmra.mrb[16].mxu0 %vm2409_vm15, %v3313_v43  ;;  %2893 = vmatpush3.bf16.msra.mxu1 %v3168_v62  ;;  %vm1735_vm15 = vcmp.eq.s32.totalorder %v3461_v38, %v1733_v51 }
 0x130   :  { %2873 = vmatpush3.bf16.msra.mxu0 %v3167_v63  ;;  %2894 = vmatprep.subr.bf16.mxu1 %v3297_v2  ;;  %v3212_v63 = vld [vmem:[#allocation2 + $0x3f0] sm:$0xff]   ;;  %vm2469_vm3 = vmpackc.low %vm1735_vm15, %vm1734_vm1 }
 0x131   :  { %2874 = vmatprep.subr.bf16.mxu0 %v3297_v2  ;;  %2888 = vmatprep.mubr.msk.bf16.mxu0 %vm3298_vm0, %v3297_v2 }
 0x132   :  { %2908 = vmatprep.mubr.msk.bf16.mxu1 %vm3298_vm0, %v3297_v2 }
 0x133   :  { %2895 = vmatpush3.bf16.msra.mxu1 %v3170_v0 }
 0x134   :  { %2875 = vmatpush3.bf16.msra.mxu0 %v3169_v1  ;;  %2896 = vmatprep.subr.bf16.mxu1 %v3297_v2 }
 0x135   :  { %2876 = vmatprep.subr.bf16.mxu0 %v3297_v2 }
 0x137   :  { %2897 = vmatpush3.bf16.msra.mxu1 %v3172_v3  ;;  %v3211_v3 = vld [vmem:[#allocation2 + $0x3b0] sm:$0xff]  }
 0x138   :  { %2877 = vmatpush3.bf16.msra.mxu0 %v3171_v4  ;;  %2898 = vmatprep.subr.bf16.mxu1 %v3297_v2 }
 0x139   :  { %2878 = vmatprep.subr.bf16.mxu0 %v3297_v2 }
 0x13b   :  { %2899 = vmatpush3.bf16.msra.mxu1 %v3174_v5 }
 0x13c   :  { %2879 = vmatpush3.bf16.msra.mxu0 %v3173_v6  ;;  %2900 = vmatprep.subr.bf16.mxu1 %v3297_v2  ;;  %v1852_v6 = vpop.permute.xlu0 %1851 }
 0x13d   :  { %2880 = vmatprep.subr.bf16.mxu0 %v3297_v2  ;;  %vm1854_vm14 = vcmp.eq.s32.totalorder %v3461_v38, %v1852_v6 }
 0x13e   :  { %vm2479_vm2 = vmpackc.low %vm1854_vm14, %vm1853_vm13 }
 0x13f   :  { %2901 = vmatpush3.bf16.msra.mxu1 %v3176_v7  ;;  %v3214_v7 = vld [vmem:[#allocation2 + $0x3f8] sm:$0xff]  }
 0x140   :  { %2881 = vmatpush3.bf16.msra.mxu0 %v3175_v9  ;;  %2902 = vmatprep.subr.bf16.mxu1 %v3297_v2 }
 0x141   :  { %2882 = vmatprep.subr.bf16.mxu0 %v3297_v2 }
 0x143   :  { %2903 = vmatpush3.bf16.msra.mxu1 %v3178_v10 }
 0x144   :  { %2883 = vmatpush3.bf16.msra.mxu0 %v3177_v11  ;;  %2904 = vmatprep.subr.bf16.mxu1 %v3297_v2 }
 0x145   :  { %2884 = vmatprep.subr.bf16.mxu0 %v3297_v2 }
 0x147   :  { %2905 = vmatpush3.bf16.msra.mxu1 %v3180_v13 }
 0x148   :  { %2885 = vmatpush3.bf16.msra.mxu0 %v3179_v14  ;;  %2906 = vmatprep.subr.bf16.mxu1 %v3297_v2 }
 0x149   :  { %2886 = vmatprep.subr.bf16.mxu0 %v3297_v2 }
 0x14b   :  { %2907 = vmatpush3.bf16.msra.mxu1 %v3182_v17 }
 0x14c   :  { %2887 = vmatpush3.bf16.msra.mxu0 %v3181_v18  ;;  %2932 = vmatprep.subr.bf16.mxu1 %v3297_v2 }
 0x14d   :  { %2912 = vmatprep.subr.bf16.mxu0 %v3297_v2 }
 0x14e   :  { %2909 = vmatmul.mubr.msk.bf16.vlgmr.msra.gmra.mrb[20].mxu1 %vm2439_vm5, %v3313_v43  ;;  %vm2274_vm5 = vcmask 7168  }
 0x14f   :  { %2889 = vmatmul.mubr.msk.bf16.vlgmr.msra.gmra.mrb[20].mxu0 %vm2429_vm6, %v3313_v43  ;;  %2933 = vmatpush3.bf16.msra.mxu1 %v3184_v19 }
 0x150   :  { %2913 = vmatpush3.bf16.msra.mxu0 %v3183_v20  ;;  %2934 = vmatprep.subr.bf16.mxu1 %v3297_v2 }
 0x151   :  { %2914 = vmatprep.subr.bf16.mxu0 %v3297_v2  ;;  %2928 = vmatprep.mubr.msk.bf16.mxu0 %vm3298_vm0, %v3297_v2 }
 0x152   :  { %2948 = vmatprep.mubr.msk.bf16.mxu1 %vm3298_vm0, %v3297_v2 }
 0x153   :  { %2935 = vmatpush3.bf16.msra.mxu1 %v3186_v21 }
 0x154   :  { %2915 = vmatpush3.bf16.msra.mxu0 %v3185_v22  ;;  %2936 = vmatprep.subr.bf16.mxu1 %v3297_v2 }
 0x155   :  { %2916 = vmatprep.subr.bf16.mxu0 %v3297_v2 }
 0x157   :  { %2937 = vmatpush3.bf16.msra.mxu1 %v3188_v23 }
 0x158   :  { %2917 = vmatpush3.bf16.msra.mxu0 %v3187_v24  ;;  %2938 = vmatprep.subr.bf16.mxu1 %v3297_v2 }
 0x159   :  { %2918 = vmatprep.subr.bf16.mxu0 %v3297_v2 }
 0x15b   :  { %2939 = vmatpush3.bf16.msra.mxu1 %v3190_v25 }
 0x15c   :  { %2919 = vmatpush3.bf16.msra.mxu0 %v3189_v26  ;;  %2940 = vmatprep.subr.bf16.mxu1 %v3297_v2 }
 0x15d   :  { %2920 = vmatprep.subr.bf16.mxu0 %v3297_v2 }
 0x15f   :  { %2941 = vmatpush3.bf16.msra.mxu1 %v3192_v28 }
 0x160   :  { %2921 = vmatpush3.bf16.msra.mxu0 %v3191_v29  ;;  %2942 = vmatprep.subr.bf16.mxu1 %v3297_v2 }
 0x161   :  { %2922 = vmatprep.subr.bf16.mxu0 %v3297_v2 }
 0x163   :  { %2943 = vmatpush3.bf16.msra.mxu1 %v3194_v30 }
 0x164   :  { %2923 = vmatpush3.bf16.msra.mxu0 %v3193_v32  ;;  %2944 = vmatprep.subr.bf16.mxu1 %v3297_v2  ;;  %v3215_v32 = vld [vmem:[#allocation4] sm:$0xff]  }
 0x165   :  { %2924 = vmatprep.subr.bf16.mxu0 %v3297_v2 }
 0x167   :  { %2945 = vmatpush3.bf16.msra.mxu1 %v3196_v33  ;;  %v3216_v33 = vld [vmem:[#allocation4 + $0x8] sm:$0xff]  }
 0x168   :  { %2925 = vmatpush3.bf16.msra.mxu0 %v3195_v34  ;;  %2946 = vmatprep.subr.bf16.mxu1 %v3297_v2  ;;  %v3217_v34 = vld [vmem:[#allocation4 + $0x10] sm:$0xff]  }
 0x169   :  { %2926 = vmatprep.subr.bf16.mxu0 %v3297_v2 }
 0x16b   :  { %2947 = vmatpush3.bf16.msra.mxu1 %v3198_v37  ;;  %v3219_v37 = vld [vmem:[#allocation4 + $0x20] sm:$0xff]  }
 0x16c   :  { %2927 = vmatpush3.bf16.msra.mxu0 %v3197_v40  ;;  %2972 = vmatprep.subr.bf16.mxu1 %v3297_v2 }
 0x16d   :  { %2952 = vmatprep.subr.bf16.mxu0 %v3297_v2 }
 0x16e   :  { %2949 = vmatmul.mubr.msk.bf16.vlgmr.msra.gmra.mrb[24].mxu1 %vm2459_vm11, %v3313_v43 }
 0x16f   :  { %2929 = vmatmul.mubr.msk.bf16.vlgmr.msra.gmra.mrb[24].mxu0 %vm2449_vm12, %v3313_v43  ;;  %2973 = vmatpush3.bf16.msra.mxu1 %v3200_v41 }
 0x170   :  { %2953 = vmatpush3.bf16.msra.mxu0 %v3199_v42  ;;  %2974 = vmatprep.subr.bf16.mxu1 %v3297_v2  ;;  %v3220_v42 = vld [vmem:[#allocation4 + $0x28] sm:$0xff]  }
 0x171   :  { %2954 = vmatprep.subr.bf16.mxu0 %v3297_v2  ;;  %2968 = vmatprep.mubr.msk.bf16.mxu0 %vm3298_vm0, %v3297_v2 }
 0x172   :  { %2988 = vmatprep.mubr.msk.bf16.mxu1 %vm3298_vm0, %v3297_v2 }
 0x173   :  { %2975 = vmatpush3.bf16.msra.mxu1 %v3202_v44 }
 0x174   :  { %2955 = vmatpush3.bf16.msra.mxu0 %v3201_v45  ;;  %2976 = vmatprep.subr.bf16.mxu1 %v3297_v2 }
 0x175   :  { %2956 = vmatprep.subr.bf16.mxu0 %v3297_v2 }
 0x177   :  { %2977 = vmatpush3.bf16.msra.mxu1 %v3204_v46 }
 0x178   :  { %2957 = vmatpush3.bf16.msra.mxu0 %v3203_v47  ;;  %2978 = vmatprep.subr.bf16.mxu1 %v3297_v2 }
 0x179   :  { %2958 = vmatprep.subr.bf16.mxu0 %v3297_v2 }
 0x17b   :  { %2979 = vmatpush3.bf16.msra.mxu1 %v3206_v48 }
 0x17c   :  { %2959 = vmatpush3.bf16.msra.mxu0 %v3205_v49  ;;  %2980 = vmatprep.subr.bf16.mxu1 %v3297_v2 }
 0x17d   :  { %2960 = vmatprep.subr.bf16.mxu0 %v3297_v2 }
 0x17f   :  { %2981 = vmatpush3.bf16.msra.mxu1 %v3208_v50 }
 0x180   :  { %2961 = vmatpush3.bf16.msra.mxu0 %v3207_v52  ;;  %2982 = vmatprep.subr.bf16.mxu1 %v3297_v2  ;;  %v3221_v52 = vld [vmem:[#allocation4 + $0x30] sm:$0xff]  }
 0x181   :  { %v293_v56 = vpop.f32.mrb[0].mxu1  ;;  %2962 = vmatprep.subr.bf16.mxu0 %v3297_v2 }
 0x182   :  { %v204_v58 = vpop.f32.mrb[0].mxu0  ;;  %v2710_v59 = vpop.f32.mrb[1].mxu1 }
 0x183   :  { %v294_v60 = vadd.f32 %v293_v56, %v204_v58  ;;  %v2690_v61 = vpop.f32.mrb[1].mxu0  ;;  %2983 = vmatpush3.bf16.msra.mxu1 %v3210_v53  ;;  %v296_v62 = vpop.f32.mrb[2].mxu1  ;;  %v3224_v56 = vld [vmem:[%s3730_s6 + $0x8] sm:$0xff]   ;;  %v3226_v58 = vld [vmem:[%s3730_s6 + $0x18] sm:$0xff]   ;;  %v3227_v59 = vld [vmem:[%s3730_s6 + $0x20] sm:$0xff]  }
 0x184   :  { %2963 = vmatpush3.bf16.msra.mxu0 %v3209_v55  ;;  %v207_v0 = vpop.f32.mrb[2].mxu0  ;;  %v2711_v1 = vpop.f32.mrb[3].mxu1  ;;  %2984 = vmatprep.subr.bf16.mxu1 %v3297_v2  ;;  %v3223_v55 = vld [vmem:[%s3730_s6] sm:$0xff]   ;;  %v3228_v61 = vld [vmem:[%s3730_s6 + $0x28] sm:$0xff]  }
 0x185   :  { %v297_v4 = vadd.f32 %v296_v62, %v207_v0  ;;  %v2691_v5 = vpop.f32.mrb[3].mxu0  ;;  %2964 = vmatprep.subr.bf16.mxu0 %v3297_v2 }
 0x187   :  { %2985 = vmatpush3.bf16.msra.mxu1 %v3212_v63 }
 0x188   :  { %2965 = vmatpush3.bf16.msra.mxu0 %v3211_v3  ;;  %2986 = vmatprep.subr.bf16.mxu1 %v3297_v2 }
 0x189   :  { %2966 = vmatprep.subr.bf16.mxu0 %v3297_v2 }
 0x18b   :  { %2987 = vmatpush3.bf16.msra.mxu1 %v3214_v7 }
 0x18c   :  { %2967 = vmatpush3.bf16.msra.mxu0 %v3213_v8  ;;  %3012 = vmatprep.subr.bf16.mxu1 %v3297_v2 }
 0x18d   :  { %2992 = vmatprep.subr.bf16.mxu0 %v3297_v2 }
 0x18e   :  { %2989 = vmatmul.mubr.msk.bf16.vlgmr.msra.gmra.mrb[28].mxu1 %vm2479_vm2, %v3313_v43 }
 0x18f   :  { %2969 = vmatmul.mubr.msk.bf16.vlgmr.msra.gmra.mrb[28].mxu0 %vm2469_vm3, %v3313_v43  ;;  %3028 = vmatprep.mubr.msk.bf16.mxu1 %vm3298_vm0, %v3297_v2 }
 0x190   :  { %3008 = vmatprep.mubr.msk.bf16.mxu0 %vm3298_vm0, %v3297_v2  ;;  %2993 = vmatpush3.bf16.msra.mxu0 %v3215_v32 }
 0x191   :  { %2994 = vmatprep.subr.bf16.mxu0 %v3297_v2  ;;  %3013 = vmatpush3.bf16.msra.mxu1 %v3223_v55  ;;  %v3230_v55 = vld [vmem:[%s3730_s6 + $0x38] sm:$0xff]  }
 0x192   :  { %3014 = vmatprep.subr.bf16.mxu1 %v3297_v2 }
 0x194   :  { %2995 = vmatpush3.bf16.msra.mxu0 %v3216_v33 }
 0x195   :  { %2996 = vmatprep.subr.bf16.mxu0 %v3297_v2  ;;  %3015 = vmatpush3.bf16.msra.mxu1 %v3224_v56  ;;  %v2482_v56 = vld [vmem:[%s3729_s5] ss:$0 sm:$0xff] }
 0x196   :  { %3016 = vmatprep.subr.bf16.mxu1 %v3297_v2 }
 0x198   :  { %2997 = vmatpush3.bf16.msra.mxu0 %v3217_v34 }
 0x199   :  { %2998 = vmatprep.subr.bf16.mxu0 %v3297_v2  ;;  %3017 = vmatpush3.bf16.msra.mxu1 %v3225_v57 }
 0x19a   :  { %3018 = vmatprep.subr.bf16.mxu1 %v3297_v2 }
 0x19c   :  { %2999 = vmatpush3.bf16.msra.mxu0 %v3218_v36 }
 0x19d   :  { %3000 = vmatprep.subr.bf16.mxu0 %v3297_v2  ;;  %3019 = vmatpush3.bf16.msra.mxu1 %v3226_v58 }
 0x19e   :  { %3020 = vmatprep.subr.bf16.mxu1 %v3297_v2 }
 0x1a0   :  { %3001 = vmatpush3.bf16.msra.mxu0 %v3219_v37 }
 0x1a1   :  { %v529_v9 = vpop.f32.mrb[4].mxu1  ;;  %3002 = vmatprep.subr.bf16.mxu0 %v3297_v2  ;;  %3021 = vmatpush3.bf16.msra.mxu1 %v3227_v59 }
 0x1a2   :  { %v410_v10 = vpop.f32.mrb[4].mxu0  ;;  %v2750_v11 = vpop.f32.mrb[5].mxu1  ;;  %3022 = vmatprep.subr.bf16.mxu1 %v3297_v2 }
 0x1a3   :  { %v417_v12 = vadd.f32 %v410_v10, %v294_v60  ;;  %v2730_v13 = vpop.f32.mrb[5].mxu0  ;;  %v532_v14 = vpop.f32.mrb[6].mxu1 }
 0x1a4   :  { %v413_v15 = vpop.f32.mrb[6].mxu0  ;;  %v2751_v16 = vpop.f32.mrb[7].mxu1  ;;  %3003 = vmatpush3.bf16.msra.mxu0 %v3220_v42 }
 0x1a5   :  { %v536_v17 = vadd.f32 %v529_v9, %v417_v12  ;;  %v418_v18 = vadd.f32 %v413_v15, %v297_v4  ;;  %v2731_v19 = vpop.f32.mrb[7].mxu0  ;;  %3004 = vmatprep.subr.bf16.mxu0 %v3297_v2  ;;  %3023 = vmatpush3.bf16.msra.mxu1 %v3228_v61 }
 0x1a6   :  { %3024 = vmatprep.subr.bf16.mxu1 %v3297_v2 }
 0x1a7   :  { %v537_v20 = vadd.f32 %v532_v14, %v418_v18 }
 0x1a8   :  { %3005 = vmatpush3.bf16.msra.mxu0 %v3221_v52 }
 0x1a9   :  { %3006 = vmatprep.subr.bf16.mxu0 %v3297_v2 }
 0x1ac   :  { %3007 = vmatpush3.bf16.msra.mxu0 %v3222_v54  ;;  %v3229_v54 = vld [vmem:[%s3730_s6 + $0x30] sm:$0xff]  }
 0x1ad   :  { %3025 = vmatpush3.bf16.msra.mxu1 %v3229_v54 }
 0x1ae   :  { %3026 = vmatprep.subr.bf16.mxu1 %v3297_v2 }
 0x1b1   :  { %3027 = vmatpush3.bf16.msra.mxu1 %v3230_v55 }
 0x1c1   :  { %v767_v21 = vpop.f32.mrb[8].mxu1 }
 0x1c2   :  { %v648_v43 = vpop.f32.mrb[8].mxu0  ;;  %v2790_v22 = vpop.f32.mrb[9].mxu1 }
 0x1c3   :  { %v655_v23 = vadd.f32 %v648_v43, %v536_v17  ;;  %v2770_v24 = vpop.f32.mrb[9].mxu0  ;;  %v770_v25 = vpop.f32.mrb[10].mxu1 }
 0x1c4   :  { %v651_v26 = vpop.f32.mrb[10].mxu0  ;;  %v2791_v27 = vpop.f32.mrb[11].mxu1 }
 0x1c5   :  { %v774_v28 = vadd.f32 %v767_v21, %v655_v23  ;;  %v656_v29 = vadd.f32 %v651_v26, %v537_v20  ;;  %v2771_v30 = vpop.f32.mrb[11].mxu0 }
 0x1c7   :  { %v775_v31 = vadd.f32 %v770_v25, %v656_v29 }
 0x1e1   :  { %v1005_v39 = vpop.f32.mrb[12].mxu1 }
 0x1e2   :  { %v886_v40 = vpop.f32.mrb[12].mxu0  ;;  %v2830_v41 = vpop.f32.mrb[13].mxu1 }
 0x1e3   :  { %v893_v44 = vadd.f32 %v886_v40, %v774_v28  ;;  %v2810_v45 = vpop.f32.mrb[13].mxu0  ;;  %v1008_v46 = vpop.f32.mrb[14].mxu1  ;;  %v2481_v41 = vld [vmem:[%s3727_s3] ss:$0 sm:$0xff] }
 0x1e4   :  { %v889_v47 = vpop.f32.mrb[14].mxu0  ;;  %v2831_v48 = vpop.f32.mrb[15].mxu1 }
 0x1e5   :  { %v1012_v49 = vadd.f32 %v1005_v39, %v893_v44  ;;  %v894_v50 = vadd.f32 %v889_v47, %v775_v31  ;;  %v2811_v51 = vpop.f32.mrb[15].mxu0 }
 0x1e7   :  { %v1013_v53 = vadd.f32 %v1008_v46, %v894_v50 }
 0x201   :  { %v1243_v60 = vpop.f32.mrb[16].mxu1 }
 0x202   :  { %v1124_v62 = vpop.f32.mrb[16].mxu0  ;;  %v2870_v63 = vpop.f32.mrb[17].mxu1 }
 0x203   :  { %v1131_v0 = vadd.f32 %v1124_v62, %v1012_v49  ;;  %v2850_v1 = vpop.f32.mrb[17].mxu0  ;;  %v1246_v3 = vpop.f32.mrb[18].mxu1 }
 0x204   :  { %v1127_v4 = vpop.f32.mrb[18].mxu0  ;;  %v2871_v5 = vpop.f32.mrb[19].mxu1 }
 0x205   :  { %v1250_v6 = vadd.f32 %v1243_v60, %v1131_v0  ;;  %v1132_v7 = vadd.f32 %v1127_v4, %v1013_v53  ;;  %v2851_v8 = vpop.f32.mrb[19].mxu0 }
 0x207   :  { %v1251_v9 = vadd.f32 %v1246_v3, %v1132_v7  ;;  %v2491_v3 = vld [vmem:[%s3731_s7] ss:$0 sm:$0xff] }
 0x221   :  { %v1481_v10 = vpop.f32.mrb[20].mxu1 }
 0x222   :  { %v1362_v11 = vpop.f32.mrb[20].mxu0  ;;  %v2910_v12 = vpop.f32.mrb[21].mxu1 }
 0x223   :  { %v1369_v13 = vadd.f32 %v1362_v11, %v1250_v6  ;;  %v2890_v14 = vpop.f32.mrb[21].mxu0  ;;  %v1484_v15 = vpop.f32.mrb[22].mxu1 }
 0x224   :  { %v1365_v16 = vpop.f32.mrb[22].mxu0  ;;  %v2911_v17 = vpop.f32.mrb[23].mxu1 }
 0x225   :  { %v1488_v18 = vadd.f32 %v1481_v10, %v1369_v13  ;;  %v1370_v19 = vadd.f32 %v1365_v16, %v1251_v9  ;;  %v2891_v20 = vpop.f32.mrb[23].mxu0 }
 0x227   :  { %v1489_v21 = vadd.f32 %v1484_v15, %v1370_v19  ;;  %v2240_v19 = vld [vmem:[%s3725_s1 + $0x8] sm:$0xff] }
 0x241   :  { %v1719_v43 = vpop.f32.mrb[24].mxu1 }
 0x242   :  { %v1600_v22 = vpop.f32.mrb[24].mxu0  ;;  %v2950_v23 = vpop.f32.mrb[25].mxu1 }
 0x243   :  { %v1607_v24 = vadd.f32 %v1600_v22, %v1488_v18  ;;  %v2930_v25 = vpop.f32.mrb[25].mxu0  ;;  %v1722_v26 = vpop.f32.mrb[26].mxu1  ;;  %v2239_v18 = vld [vmem:[%s3725_s1] sm:$0xff] }
 0x244   :  { %v1603_v27 = vpop.f32.mrb[26].mxu0  ;;  %v2951_v28 = vpop.f32.mrb[27].mxu1 }
 0x245   :  { %v1726_v29 = vadd.f32 %v1719_v43, %v1607_v24  ;;  %v1608_v30 = vadd.f32 %v1603_v27, %v1489_v21  ;;  %v2931_v31 = vpop.f32.mrb[27].mxu0 }
 0x247   :  { %v1727_v32 = vadd.f32 %v1722_v26, %v1608_v30 }
 0x261   :  { %v1957_v33 = vpop.f32.mrb[28].mxu1 }
 0x262   :  { %v1838_v34 = vpop.f32.mrb[28].mxu0  ;;  %v2990_v36 = vpop.f32.mrb[29].mxu1 }
 0x263   :  { %v1845_v37 = vadd.f32 %v1838_v34, %v1726_v29  ;;  %v2970_v39 = vpop.f32.mrb[29].mxu0  ;;  %v1960_v40 = vpop.f32.mrb[30].mxu1 }
 0x264   :  { %v1841_v42 = vpop.f32.mrb[30].mxu0  ;;  %v2991_v44 = vpop.f32.mrb[31].mxu1  ;;  %v2502_v39 = vld [vmem:[%s3732_s8] ss:$0 sm:$0xff] }
 0x265   :  { %v1964_v45 = vadd.f32 %v1957_v33, %v1845_v37  ;;  %v1846_v46 = vadd.f32 %v1841_v42, %v1727_v32  ;;  %v2971_v47 = vpop.f32.mrb[31].mxu0 }
 0x267   :  { %v1973_v48 = vadd.f32 %v2481_v41, %v1964_v45  ;;  %v1965_v49 = vadd.f32 %v1960_v40, %v1846_v46 }
 0x269   :  { %v1974_v50 = vadd.f32 %v2481_v41, %v1965_v49  ;;  %v1975_v51 = vmax.f32 %v1973_v48, 0.0 }
 0x26b   :  { %v1976_v52 = vmax.f32 %v1974_v50, 0.0 }
 0x26d   :  { %v1977_v53 = vpack.c.bf16 %v1976_v52, %v1975_v51 }
 0x26f   :  { %3009 = vmatmul.mubr.bf16.vlgmr.msra.gmra.mrb[32].mxu0 %v1977_v53 }
 0x342   :  { %v2083_v57 = vpop.f32.mrb[32].mxu0 }
 0x343   :  { %v2084_v58 = vadd.f32 %v2482_v56, %v2083_v57  ;;  %v3010_v59 = vpop.f32.mrb[33].mxu0 }
 0x344   :  { %v2086_v60 = vpop.f32.mrb[34].mxu0 }
 0x345   :  { %v2087_v61 = vadd.f32 %v2482_v56, %v2086_v60  ;;  %v3011_v62 = vpop.f32.mrb[35].mxu0  ;;  %v2090_v63 = vmax.f32 %v2084_v58, 0.0 }
 0x347   :  { %v2091_v0 = vmax.f32 %v2087_v61, 0.0 }
 0x349   :  { %v2092_v1 = vpack.c.bf16 %v2091_v0, %v2090_v63 }
 0x34b   :  { %3029 = vmatmul.mubr.bf16.vlgmr.msra.gmra.mrb[32].mxu1 %v2092_v1 }
 0x41e   :  { %v2198_v4 = vpop.f32.mrb[32].mxu1 }
 0x41f   :  { %v2199_v5 = vadd.f32 %v2491_v3, %v2198_v4  ;;  %v3030_v6 = vpop.f32.mrb[33].mxu1 }
 0x420   :  { %v2201_v7 = vpop.f32.mrb[34].mxu1 }
 0x421   :  { %v2202_v8 = vadd.f32 %v2491_v3, %v2201_v7  ;;  %2205 = vmax.xlane.f32.xlu1 %v2199_v5  ;;  %v3031_v9 = vpop.f32.mrb[35].mxu1 }
 0x423   :  { %2207 = vmax.xlane.f32.xlu0 %v2202_v8 }
 0x4ae   :  { %v2206_v10 = vpop.xlane.xlu1 %2205 }
 0x4af   :  { %v2209_v11 = vsub.f32 %v2199_v5, %v2206_v10 }
 0x4b0   :  { %v2208_v12 = vpop.xlane.xlu0 %2207 }
 0x4b1   :  { %v2211_v13 = vmul.f32 1.442695, %v2209_v11  ;;  %v2210_v14 = vsub.f32 %v2202_v8, %v2208_v12  ;;  %v2300_v8 = vshrl.u32 %v65_v35, 7 }
 0x4b3   :  { %3231 = vpow2.f32 %v2211_v13  ;;  %v2213_v15 = vmul.f32 1.442695, %v2210_v14  ;;  %vm2301_vm6 = vcmp.eq.s32.totalorder %v2300_v8, 0 }
 0x4b4   :  { %vm2303_vm9 = vmand %vm2301_vm6, %vm2302_vm7 }
 0x4b5   :  { %3233 = vpow2.f32 %v2213_v15  ;;  %vm2307_vm10 = vmand %vm2301_vm6, %vm2306_vm8 }
 0x4bd   :  { %v3232_v16 = vpop.eup %3231 }
 0x4be   :  { %2215 = vadd.xlane.f32.xlu1 %v3232_v16 }
 0x4bf   :  { %v3234_v17 = vpop.eup %3233 }
 0x4c0   :  { %2217 = vadd.xlane.f32.xlu0 %v3234_v17 }
 0x4cf   :  { %2242 = vperm.xlu1 %3085, %v2239_v18  }
 0x4d6   :  { %2245 = vperm.xlu0 %3086, %v2240_v19  }
 0x54b   :  { %v2216_v20 = vpop.xlane.xlu1 %2215 }
 0x54c   :  { %3235 = vrcp.f32 %v2216_v20 }
 0x54d   :  { %3237 = vlog2.f32 %v2216_v20  ;;  %v2218_v21 = vpop.xlane.xlu0 %2217 }
 0x54e   :  { %3239 = vrcp.f32 %v2218_v21 }
 0x54f   :  { %3241 = vlog2.f32 %v2218_v21  ;;  %v2243_v43 = vpop.permute.xlu1 %2242 }
 0x550   :  { %vm2247_vm0 = vcmp.eq.s32.totalorder %v3461_v38, %v2243_v43 }
 0x551   :  { %v2249_v30 = vsel %vm2247_vm0, 1.0, %v3297_v2 }
 0x552   :  { %v2258_v41 = vmul.f32 %v2502_v39, %v2249_v30 }
 0x555   :  { %v2246_v22 = vpop.permute.xlu0 %2245 }
 0x556   :  { %v3236_v23 = vpop.eup %3235  ;;  %vm2248_vm4 = vcmp.eq.s32.totalorder %v3461_v38, %v2246_v22 }
 0x557   :  { %v3238_v24 = vpop.eup %3237  ;;  %v2221_v28 = vmul.f32 %v3236_v23, %v3232_v16  ;;  %v2250_v34 = vsel %vm2248_vm4, 1.0, %v3297_v2 }
 0x558   :  { %v3240_v25 = vpop.eup %3239  ;;  %v2234_v26 = vmul.f32 0.6931472, %v3238_v24  ;;  %v2259_v42 = vmul.f32 %v2502_v39, %v2250_v34 }
 0x559   :  { %v3242_v27 = vpop.eup %3241  ;;  %v2222_v29 = vmul.f32 %v3240_v25, %v3234_v17 }
 0x55a   :  { %v2236_v31 = vmul.f32 0.6931472, %v3242_v27  ;;  %v2237_v32 = vsub.f32 %v2209_v11, %v2234_v26 }
 0x55b   :  { %v2508_v33 = vpack.c.bf16 %v2222_v29, %v2221_v28 }
 0x55c   :  { %v2264_v36 = vmul.f32 %v2249_v30, %v2237_v32  ;;  %v2238_v37 = vsub.f32 %v2210_v14, %v2236_v31 }
 0x55d   :  { %2509 = vst [vmem:[%s3733_s9] sm:$0xff] %v2508_v33  }
 0x55e   :  { %2266 = vadd.xlane.f32.xlu1 %v2264_v36  ;;  %v2265_v40 = vmul.f32 %v2250_v34, %v2238_v37 }
 0x560   :  { %2268 = vadd.xlane.f32.xlu0 %v2265_v40 }
 0x562   :  { %2260 = vadd.xlane.f32.xlu1 %v2258_v41 }
 0x566   :  { %2262 = vadd.xlane.f32.xlu1 %v2259_v42 }
 0x5eb   :  { %v2267_v44 = vpop.xlane.xlu1 %2266 }
 0x5ec   :  { %v2270_v46 = vsub.f32 0.0, %v2267_v44 }
 0x5ed   :  { %v2269_v45 = vpop.xlane.xlu0 %2268 }
 0x5ee   :  { %v2271_v47 = vsub.f32 0.0, %v2269_v45 }
 0x5ef   :  { %v2261_v2 = vpop.xlane.xlu1 %2260 }
 0x5f0   :  { %v2272_v48 = vmul.f32 %v2270_v46, %v2261_v2  ;;  %v2287_v55 = vsel %vm2274_vm5, %v2261_v2, 0.0 }
 0x5f2   :  { %v2275_v51 = vsel %vm2274_vm5, %v2272_v48, 0.0 }
 0x5f3   :  { %v2263_v49 = vpop.xlane.xlu1 %2262 }
 0x5f4   :  { %v2273_v50 = vmul.f32 %v2271_v47, %v2263_v49  ;;  %v2288_v54 = vsel %vm2274_vm5, %v2263_v49, 0.0 }
 0x5f5   :  { %v2289_v56 = vadd.f32 %v2288_v54, %v2287_v55 }
 0x5f6   :  { %v2276_v52 = vsel %vm2274_vm5, %v2273_v50, 0.0 }
 0x5f7   :  { %v2277_v53 = vadd.f32 %v2276_v52, %v2275_v51 }
 0x5f9   :  { %2278 = vadd.xlane.f32.xlu1 %v2277_v53 }
 0x5fd   :  { %2290 = vadd.xlane.f32.xlu1 %v2289_v56 }
 0x686   :  { %v2279_v57 = vpop.xlane.xlu1 %2278 }
 0x687   :  { %v2280_v58 = vrot.slane %v2279_v57, 4 }
 0x689   :  { %v2281_v59 = vadd.f32 %v2280_v58, %v2279_v57 }
 0x68a   :  { %v2291_v60 = vpop.xlane.xlu1 %2290 }
 0x68b   :  { %v2282_v61 = vrot.slane %v2281_v59, 2  ;;  %v2292_v62 = vrot.slane %v2291_v60, 4 }
 0x68d   :  { %v2293_v63 = vadd.f32 %v2292_v62, %v2291_v60  ;;  %v2283_v0 = vadd.f32 %v2282_v61, %v2281_v59 }
 0x68f   :  { %v2294_v1 = vrot.slane %v2293_v63, 2  ;;  %v2284_v3 = vrot.slane %v2283_v0, 1 }
 0x691   :  { %v2295_v4 = vadd.f32 %v2294_v1, %v2293_v63  ;;  %v2285_v5 = vadd.f32 %v2284_v3, %v2283_v0 }
 0x693   :  { %3032 = vpush %v2285_v5  ;;  %v2296_v6 = vrot.slane %v2295_v4, 1 }
 0x695   :  { %v2297_v7 = vadd.f32 %v2296_v6, %v2295_v4 }
 0x697   :  { %3034 = vpush %v2297_v7 }
 0x6c4   :  { %s3033_s8 = spop %3032 }
 0x6c5   :  { %v2304_v9 = vstv %s3033_s8 }
 0x6c6   :  { %v2305_v10 = vsel %vm2303_vm9, %v2304_v9, 0.0 }
 0x6c8   :  { %s3035_s9 = spop %3034 }
 0x6c9   :  { %v2308_v11 = vstv %s3035_s9 }
 0x6ca   :  { %v2309_v12 = vsel %vm2307_vm10, %v2308_v11, %v2305_v10 }
 0x6cb   :  { %2310 = vst [vmem:[%s3734_s10] sm:$0xff] %v2309_v12 }
 0x6cc   :  { %2319 = vsyncpa [#allocation3], 1 }
 0x6cd   :  { %2320 = vsyncpa [#allocation5], 1 }

</bundles_post_ra>
